<compile_context>
chip_gen: v6e
topology: v6e:2x2x1
jax: 0.10.0
libtpu: 0.0.40
codegen_flags: <defaults>
</compile_context>

<pallas_src>
import numpy as np

import jax
import jax.numpy as jnp
from jax.experimental import pallas as pl
from jax.experimental.pallas import tpu as pltpu


def _round_up(x, m):
    return (x + m - 1) // m * m


# ----------------------------------------------------------------------------- kernel
def _stft_loss_kernel(xf_ref, yf_ref, basis_ref, out_ref):
    """One frame-tile of the STFT loss.

    xf_ref / yf_ref : (TM, N) bf16 raw (un-windowed) frames of x / y.
    basis_ref       : (N, 2*FP) bf16 windowed DFT basis, cols [0:FP] win*cos,
                      [FP:2FP] -win*sin (Nyquist dropped; FP multiple of 128).
    out_ref         : (1, 3, 128) f32 lane-partial sums:
                      row 0 = sum((y_mag - x_mag)^2)
                      row 1 = sum(y_mag^2)     (contains known clamp bias of padding)
                      row 2 = sum(|log(y_mag) - log(x_mag)|)
    """
    basis = basis_ref[...]
    # Two bf16 MXU dots (f32 accumulate) against the resident basis.
    spec_x = jnp.dot(xf_ref[...], basis, preferred_element_type=jnp.float32)
    spec_y = jnp.dot(yf_ref[...], basis, preferred_element_type=jnp.float32)

    fp = spec_x.shape[1] // 2
    xr, xi = spec_x[:, :fp], spec_x[:, fp:]
    yr, yi = spec_y[:, :fp], spec_y[:, fp:]

    # torch: mag = sqrt(clamp(re^2 + im^2, min=1e-7)); work with mag^2 to cut EUP ops.
    x_sq = jnp.maximum(xr * xr + xi * xi, 1e-7)
    y_sq = jnp.maximum(yr * yr + yi * yi, 1e-7)

    # (y_mag - x_mag)^2 = x_sq + y_sq - 2*sqrt(x_sq*y_sq); clamp at 0 against
    # cancellation when x_mag ~= y_mag (one sqrt instead of two).
    num = jnp.maximum(x_sq + y_sq - 2.0 * jnp.sqrt(x_sq * y_sq), 0.0)
    # |log y_mag - log x_mag| = 0.5 * |log y_sq - log x_sq|
    logd = jnp.abs(jnp.log(y_sq) - jnp.log(x_sq))

    def lane_fold(v):
        # (TM, FP) -> (1, 128): 128-aligned static lane-group adds (VPU) then a
        # single sublane reduce; the final cross-lane sum happens outside.
        acc = v[:, 0:128]
        for g in range(1, fp // 128):
            acc = acc + v[:, g * 128:(g + 1) * 128]
        return jnp.sum(acc, axis=0, keepdims=True)

    out_ref[0] = jnp.concatenate(
        [lane_fold(num), lane_fold(y_sq), 0.5 * lane_fold(logd)], axis=0)


def _stft_loss_sums(xf, yf, basis, num_tiles, tm, fft_size, fp):
    """Run the tiled kernel and reduce the per-tile lane-partial sums."""
    n = fft_size
    p_pad = num_tiles * tm
    cost = pl.CostEstimate(
        flops=4 * p_pad * n * (2 * fp),                    # two (TM,N)@(N,2FP) dots
        transcendentals=3 * p_pad * fp,                    # sqrt + 2x log per cell
        bytes_accessed=2 * p_pad * n * 2 + n * 2 * fp * 2 + num_tiles * 3 * 128 * 4,
    )
    partial = pl.pallas_call(
        _stft_loss_kernel,
        out_shape=jax.ShapeDtypeStruct((num_tiles, 3, 128), jnp.float32),
        grid=(num_tiles,),
        in_specs=[
            # frame tiles stream through a double-buffered pipeline
            pl.BlockSpec((tm, n), lambda i: (i, 0)),
            pl.BlockSpec((tm, n), lambda i: (i, 0)),
            # basis block index is constant in the tile axis -> stays VMEM-resident
            pl.BlockSpec((n, 2 * fp), lambda i: (0, 0)),
        ],
        out_specs=pl.BlockSpec((1, 3, 128), lambda i: (i, 0, 0)),
        compiler_params=pltpu.CompilerParams(
            dimension_semantics=("parallel",),          # shards tiles across v7x's 2 TCs
            vmem_limit_bytes=48 * 1024 * 1024,          # < 64 MiB physical on v7x
        ),
        cost_estimate=cost,
    )(xf, yf, basis)
    sums = jnp.sum(partial, axis=(0, 2))                # (3,)
    return sums[0], sums[1], sums[2]


# ------------------------------------------------------------------------- JAX "glue"
def _hann_window_np(win_length):
    # torch.hann_window(win_length) (periodic=True)
    m = np.arange(win_length, dtype=np.float64)
    return 0.5 - 0.5 * np.cos(2.0 * np.pi * m / win_length)


def _centered_window_np(fft_size, win_length):
    win_full = np.zeros((fft_size,), np.float64)
    left = (fft_size - win_length) // 2
    win_full[left:left + win_length] = _hann_window_np(win_length)
    return win_full


def _frame_bf16(x, fft_size, hop_size):
    """torch.stft framing: center=True, pad_mode='reflect'.  The window is folded
    into the DFT basis, so frames are raw bf16 samples: (B*n_frames, fft_size)."""
    # TODO(synk): framing still materializes overlapping frames in HBM (fft/hop
    # blow-up); building frame tiles in-kernel from the reflect-padded signal would
    # cut HBM traffic further but needs lane-misaligned (hop) manual DMA row copies.
    B, T = x.shape
    pad = fft_size // 2
    xp = jnp.pad(x, ((0, 0), (pad, pad)), mode="reflect").astype(jnp.bfloat16)
    n_frames = 1 + T // hop_size
    idx = jnp.arange(n_frames)[:, None] * hop_size + jnp.arange(fft_size)[None, :]
    frames = xp[:, idx]  # (B, n_frames, fft_size) bf16
    return frames.reshape(B * n_frames, fft_size)


def _windowed_dft_basis(fft_size, win_length):
    """Windowed one-sided DFT basis [win*cos | -win*sin] with the Nyquist bin
    dropped (handled in glue), freq padded to a multiple of 128 only if fft//2
    is not already one.  Also returns the windowed Nyquist column."""
    n_kern = fft_size // 2                      # DC .. Nyquist-1
    fp = _round_up(n_kern, 128)
    n = np.arange(fft_size, dtype=np.float64)
    f = np.arange(n_kern, dtype=np.float64)
    ang = 2.0 * np.pi * np.mod(n[:, None] * f[None, :], fft_size) / float(fft_size)
    win_full = _centered_window_np(fft_size, win_length)

    cos_b = np.zeros((fft_size, fp), np.float64)
    sin_b = np.zeros((fft_size, fp), np.float64)
    cos_b[:, :n_kern] = np.cos(ang) * win_full[:, None]
    sin_b[:, :n_kern] = -np.sin(ang) * win_full[:, None]
    basis = np.concatenate([cos_b, sin_b], axis=1).astype(np.float32)

    nyq_col = (win_full * np.cos(np.pi * n)).astype(np.float32)   # win * (-1)^n

    return (jnp.asarray(basis, jnp.bfloat16),
            jnp.asarray(nyq_col, jnp.bfloat16),
            n_kern, fp)


class STFTLoss:
    """Single-resolution STFT loss (spectral convergence + log-magnitude L1)."""

    def __init__(self, fft_size=1024, shift_size=120, win_length=600,
                 window="hann_window", frame_tile=None):
        assert window == "hann_window"  # TODO(synk): only hann window implemented
        self.fft_size = fft_size
        self.shift_size = shift_size
        self.win_length = win_length
        (self.basis, self.nyq_col,
         self.n_freq_kern, self.n_freq_pad) = _windowed_dft_basis(fft_size, win_length)
        if frame_tile is None:
            # sized for a 48 MiB scoped-VMEM limit (safe on v5e/v6e/v7x); raise on
            # 128-MiB-VMEM parts (v5e/v6e) together with vmem_limit_bytes for a few
            # % fewer grid-step overheads.
            frame_tile = 256 if fft_size >= 2048 else 512
        self.frame_tile = _round_up(frame_tile, 8)

    def __call__(self, x, y):
        n, fp, n_kern = self.fft_size, self.n_freq_pad, self.n_freq_kern
        n_freq = n // 2 + 1                      # full one-sided bin count (w/ Nyquist)

        xf = _frame_bf16(x, n, self.shift_size)  # (P, N) bf16, un-windowed
        yf = _frame_bf16(y, n, self.shift_size)
        p = xf.shape[0]

        tm = min(self.frame_tile, _round_up(p, 8))
        num_tiles = -(-p // tm)                  # (on v7x, an even tile count balances
        p_pad = num_tiles * tm                   #  the 2 TensorCores)

        def prep(frames):
            return jnp.pad(frames, ((0, p_pad - p), (0, 0)))

        k_num, k_den, k_log = _stft_loss_sums(prep(xf), prep(yf), self.basis,
                                              num_tiles, tm, n, fp)

        # Nyquist bin (real-valued, sin == 0) handled here so the kernel basis
        # carries no frequency padding for the production fft sizes.
        x_nyq = jnp.dot(xf, self.nyq_col, preferred_element_type=jnp.float32)
        y_nyq = jnp.dot(yf, self.nyq_col, preferred_element_type=jnp.float32)
        xn_sq = jnp.maximum(x_nyq * x_nyq, 1e-7)
        yn_sq = jnp.maximum(y_nyq * y_nyq, 1e-7)
        n_num = jnp.sum(jnp.maximum(xn_sq + yn_sq - 2.0 * jnp.sqrt(xn_sq * yn_sq), 0.0))
        n_den = jnp.sum(yn_sq)
        n_log = 0.5 * jnp.sum(jnp.abs(jnp.log(yn_sq) - jnp.log(xn_sq)))

        # remove the exact 1e-7 clamp bias contributed by padded rows / freq columns
        pad_bias = jnp.float32((p_pad * fp - p * n_kern) * 1e-7)

        sc_num = k_num + n_num
        sc_den = k_den - pad_bias + n_den
        log_sum = k_log + n_log

        sc_loss = jnp.sqrt(sc_num) / jnp.sqrt(sc_den)     # ||y-x||_F / ||y||_F
        mag_loss = log_sum / jnp.float32(p * n_freq)      # mean |log y - log x|
        return sc_loss, mag_loss


class MultiResolutionSTFTLoss:
    """Multi-resolution STFT loss (averages SC / log-mag losses over resolutions)."""

    def __init__(self, fft_sizes=(1024, 2048, 512), hop_sizes=(120, 240, 50),
                 win_lengths=(600, 1200, 240), window="hann_window", frame_tile=None):
        assert len(fft_sizes) == len(hop_sizes) == len(win_lengths)
        self.stft_losses = [STFTLoss(fs, ss, wl, window, frame_tile)
                            for fs, ss, wl in zip(fft_sizes, hop_sizes, win_lengths)]
        # single jit over all resolutions -> one launch for all three pallas_calls
        self._forward = jax.jit(self._forward_impl)

    def _forward_impl(self, x, y):
        sc_loss = jnp.float32(0.0)
        mag_loss = jnp.float32(0.0)
        for f in self.stft_losses:
            sc_l, mag_l = f(x, y)
            sc_loss = sc_loss + sc_l
            mag_loss = mag_loss + mag_l
        n = len(self.stft_losses)
        return sc_loss / n, mag_loss / n

    def __call__(self, x, y):
        return self._forward(x, y)


# ------------------------------------------------------------------ pure-JAX reference
def _frame_and_window_ref(x, fft_size, hop_size, win_length):
    """f32 torch.stft-style framing + centered zero-padded hann window (reference)."""
    B, T = x.shape
    pad = fft_size // 2
    xp = jnp.pad(x, ((0, 0), (pad, pad)), mode="reflect")
    n_frames = 1 + T // hop_size
    idx = jnp.arange(n_frames)[:, None] * hop_size + jnp.arange(fft_size)[None, :]
    frames = xp[:, idx].astype(jnp.float32)
    win_full = jnp.asarray(_centered_window_np(fft_size, win_length), jnp.float32)
    frames = frames * win_full[None, None, :]
    return frames.reshape(B * n_frames, fft_size)


def _dft_basis_ref(fft_size):
    """Unpadded f32 one-sided basis (incl. Nyquist) for the pure-JAX reference."""
    n_freq = fft_size // 2 + 1
    n = np.arange(fft_size, dtype=np.float64)[:, None]
    f = np.arange(n_freq, dtype=np.float64)[None, :]
    ang = 2.0 * np.pi * np.mod(n * f, fft_size) / float(fft_size)
    return jnp.asarray(np.cos(ang), jnp.float32), jnp.asarray(-np.sin(ang), jnp.float32)


def _reference(x, y, fft_sizes, hop_sizes, win_lengths):
    sc_tot, mag_tot = 0.0, 0.0
    for fs, ss, wl in zip(fft_sizes, hop_sizes, win_lengths):
        cb, sb = _dft_basis_ref(fs)
        xf = _frame_and_window_ref(x, fs, ss, wl)
        yf = _frame_and_window_ref(y, fs, ss, wl)
        x_mag = jnp.sqrt(jnp.maximum((xf @ cb) ** 2 + (xf @ sb) ** 2, 1e-7))
        y_mag = jnp.sqrt(jnp.maximum((yf @ cb) ** 2 + (yf @ sb) ** 2, 1e-7))
        sc_tot += jnp.linalg.norm(y_mag - x_mag) / jnp.linalg.norm(y_mag)
        mag_tot += jnp.mean(jnp.abs(jnp.log(y_mag) - jnp.log(x_mag)))
    n = len(fft_sizes)
    return sc_tot / n, mag_tot / n


# ----------------------------------------------------------------------------- driver
if __name__ == "__main__":
    key = jax.random.PRNGKey(0)
    kx, ky = jax.random.split(key)

    B, T = 2, 1024
    x = jax.random.normal(kx, (B, T), dtype=jnp.float32)
    y = jax.random.normal(ky, (B, T), dtype=jnp.float32)

    # Small resolutions (constructor args of the module) to keep the example tiny.
    fft_sizes, hop_sizes, win_lengths = [256, 512, 128], [64, 128, 32], [192, 384, 96]
    # frame_tile=32 forces multiple frame tiles at demo sizes so the gridded
    # partial-sum path is exercised; production defaults pick 256-512 rows per tile.
    loss_fn = MultiResolutionSTFTLoss(fft_sizes, hop_sizes, win_lengths, frame_tile=32)

    sc_loss, mag_loss = loss_fn(x, y)
    jax.block_until_ready((sc_loss, mag_loss))

    sc_ref, mag_ref = _reference(x, y, fft_sizes, hop_sizes, win_lengths)
    np.testing.assert_allclose(np.asarray(sc_loss), np.asarray(sc_ref),
                               rtol=3e-2, atol=2e-3)
    np.testing.assert_allclose(np.asarray(mag_loss), np.asarray(mag_ref),
                               rtol=3e-2, atol=2e-3)

    print("KERNEL_OK")
</pallas_src>

<mosaic_0001>
module attributes {stable_mosaic.version = 11 : i64} {
  func.func @_stft_loss_kernel(%arg0: i32, %arg1: memref<24x512xbf16, #tpu.memory_space<vmem>>, %arg2: memref<24x512xbf16, #tpu.memory_space<vmem>>, %arg3: memref<512x512xbf16, #tpu.memory_space<vmem>>, %arg4: memref<1x3x128xf32, #tpu.memory_space<vmem>>) attributes {dimension_semantics = [#tpu.dimension_semantics<parallel>], iteration_bounds = array<i64: 1>, scalar_prefetch = 0 : i64, scratch_operands = 0 : i64, tpu.core_type = #tpu.core_type<tc>, window_params = [{transform_indices = @transform_0, window_bounds = array<i64: 24, 512>}, {transform_indices = @transform_1, window_bounds = array<i64: 24, 512>}, {pipeline_mode = #tpu.pipeline_mode<synchronous>, transform_indices = @transform_2, window_bounds = array<i64: 512, 512>}, {transform_indices = @transform_3, window_bounds = array<i64: 1, 3, 128>}]} {
    %c0 = arith.constant 0 : index
    %c0_0 = arith.constant 0 : index
    %0 = vector.load %arg3[%c0, %c0_0] : memref<512x512xbf16, #tpu.memory_space<vmem>>, vector<512x512xbf16>
    %c0_1 = arith.constant 0 : index
    %c0_2 = arith.constant 0 : index
    %1 = vector.load %arg1[%c0_1, %c0_2] : memref<24x512xbf16, #tpu.memory_space<vmem>>, vector<24x512xbf16>
    %cst = arith.constant dense<0.000000e+00> : vector<24x512xf32>
    %2 = tpu.matmul %1, %0, %cst {dimension_numbers = #tpu.dot_dimension_numbers<[1], [0], [0], [1], [0, 0, 1, 1], [], []>} : vector<24x512xbf16>, vector<512x512xbf16>, vector<24x512xf32> -> vector<24x512xf32>
    %c0_3 = arith.constant 0 : index
    %c0_4 = arith.constant 0 : index
    %3 = vector.load %arg2[%c0_3, %c0_4] : memref<24x512xbf16, #tpu.memory_space<vmem>>, vector<24x512xbf16>
    %cst_5 = arith.constant dense<0.000000e+00> : vector<24x512xf32>
    %4 = tpu.matmul %3, %0, %cst_5 {dimension_numbers = #tpu.dot_dimension_numbers<[1], [0], [0], [1], [0, 0, 1, 1], [], []>} : vector<24x512xbf16>, vector<512x512xbf16>, vector<24x512xf32> -> vector<24x512xf32>
    %5 = vector.extract_strided_slice %2 {offsets = [0, 0], sizes = [24, 256], strides = [1, 1]} : vector<24x512xf32> to vector<24x256xf32>
    %6 = vector.extract_strided_slice %2 {offsets = [0, 256], sizes = [24, 256], strides = [1, 1]} : vector<24x512xf32> to vector<24x256xf32>
    %7 = vector.extract_strided_slice %4 {offsets = [0, 0], sizes = [24, 256], strides = [1, 1]} : vector<24x512xf32> to vector<24x256xf32>
    %8 = vector.extract_strided_slice %4 {offsets = [0, 256], sizes = [24, 256], strides = [1, 1]} : vector<24x512xf32> to vector<24x256xf32>
    %9 = arith.mulf %5, %5 : vector<24x256xf32>
    %10 = arith.mulf %6, %6 : vector<24x256xf32>
    %11 = arith.addf %9, %10 : vector<24x256xf32>
    %cst_6 = arith.constant 1.000000e-07 : f32
    %12 = vector.broadcast %cst_6 : f32 to vector<24x256xf32>
    %13 = arith.maximumf %11, %12 : vector<24x256xf32>
    %14 = arith.mulf %7, %7 : vector<24x256xf32>
    %15 = arith.mulf %8, %8 : vector<24x256xf32>
    %16 = arith.addf %14, %15 : vector<24x256xf32>
    %cst_7 = arith.constant 1.000000e-07 : f32
    %17 = vector.broadcast %cst_7 : f32 to vector<24x256xf32>
    %18 = arith.maximumf %16, %17 : vector<24x256xf32>
    %19 = arith.addf %13, %18 : vector<24x256xf32>
    %20 = arith.mulf %13, %18 : vector<24x256xf32>
    %21 = math.sqrt %20 : vector<24x256xf32>
    %cst_8 = arith.constant 2.000000e+00 : f32
    %22 = vector.broadcast %cst_8 : f32 to vector<24x256xf32>
    %23 = arith.mulf %22, %21 : vector<24x256xf32>
    %24 = arith.subf %19, %23 : vector<24x256xf32>
    %cst_9 = arith.constant 0.000000e+00 : f32
    %25 = vector.broadcast %cst_9 : f32 to vector<24x256xf32>
    %26 = arith.maximumf %24, %25 : vector<24x256xf32>
    %27 = math.log %18 : vector<24x256xf32>
    %28 = math.log %13 : vector<24x256xf32>
    %29 = arith.subf %27, %28 : vector<24x256xf32>
    %30 = math.absf %29 : vector<24x256xf32>
    %31 = vector.extract_strided_slice %26 {offsets = [0, 0], sizes = [24, 128], strides = [1, 1]} : vector<24x256xf32> to vector<24x128xf32>
    %32 = vector.extract_strided_slice %26 {offsets = [0, 128], sizes = [24, 128], strides = [1, 1]} : vector<24x256xf32> to vector<24x128xf32>
    %33 = arith.addf %31, %32 : vector<24x128xf32>
    %cst_10 = arith.constant dense<0.000000e+00> : vector<128xf32>
    %34 = vector.multi_reduction <add>, %33, %cst_10 [0] : vector<24x128xf32> to vector<128xf32>
    %35 = vector.shape_cast %34 : vector<128xf32> to vector<1x128xf32>
    %36 = vector.extract_strided_slice %18 {offsets = [0, 0], sizes = [24, 128], strides = [1, 1]} : vector<24x256xf32> to vector<24x128xf32>
    %37 = vector.extract_strided_slice %18 {offsets = [0, 128], sizes = [24, 128], strides = [1, 1]} : vector<24x256xf32> to vector<24x128xf32>
    %38 = arith.addf %36, %37 : vector<24x128xf32>
    %cst_11 = arith.constant dense<0.000000e+00> : vector<128xf32>
    %39 = vector.multi_reduction <add>, %38, %cst_11 [0] : vector<24x128xf32> to vector<128xf32>
    %40 = vector.shape_cast %39 : vector<128xf32> to vector<1x128xf32>
    %41 = vector.extract_strided_slice %30 {offsets = [0, 0], sizes = [24, 128], strides = [1, 1]} : vector<24x256xf32> to vector<24x128xf32>
    %42 = vector.extract_strided_slice %30 {offsets = [0, 128], sizes = [24, 128], strides = [1, 1]} : vector<24x256xf32> to vector<24x128xf32>
    %43 = arith.addf %41, %42 : vector<24x128xf32>
    %cst_12 = arith.constant dense<0.000000e+00> : vector<128xf32>
    %44 = vector.multi_reduction <add>, %43, %cst_12 [0] : vector<24x128xf32> to vector<128xf32>
    %45 = vector.shape_cast %44 : vector<128xf32> to vector<1x128xf32>
    %cst_13 = arith.constant 5.000000e-01 : f32
    %46 = vector.broadcast %cst_13 : f32 to vector<1x128xf32>
    %47 = arith.mulf %46, %45 : vector<1x128xf32>
    %48 = tpu.concatenate %35, %40, %47 in 0 : vector<1x128xf32>, vector<1x128xf32>, vector<1x128xf32> -> vector<3x128xf32>
    %c0_14 = arith.constant 0 : index
    %c0_15 = arith.constant 0 : index
    %c0_16 = arith.constant 0 : index
    %49 = vector.load %arg4[%c0_14, %c0_15, %c0_16] : memref<1x3x128xf32, #tpu.memory_space<vmem>>, vector<1x3x128xf32>
    %50 = vector.shape_cast %49 : vector<1x3x128xf32> to vector<3x128xf32>
    %51 = vector.shape_cast %48 : vector<3x128xf32> to vector<1x3x128xf32>
    tpu.vector_store %arg4[%c0_14, %c0_15, %c0_16], %51 {strides = array<i32>} : memref<1x3x128xf32, #tpu.memory_space<vmem>>, vector<1x3x128xf32>,
    return
  }
  func.func @transform_0(%arg0: i32) -> (i32, i32) {
    %c0_i32 = arith.constant 0 : i32
    %c0_i32_0 = arith.constant 0 : i32
    return %arg0, %c0_i32 : i32, i32
  }
  func.func @transform_1(%arg0: i32) -> (i32, i32) {
    %c0_i32 = arith.constant 0 : i32
    %c0_i32_0 = arith.constant 0 : i32
    return %arg0, %c0_i32 : i32, i32
  }
  func.func @transform_2(%arg0: i32) -> (i32, i32) {
    %c0_i32 = arith.constant 0 : i32
    %c0_i32_0 = arith.constant 0 : i32
    %c0_i32_1 = arith.constant 0 : i32
    return %c0_i32, %c0_i32_0 : i32, i32
  }
  func.func @transform_3(%arg0: i32) -> (i32, i32, i32) {
    %c0_i32 = arith.constant 0 : i32
    %c0_i32_0 = arith.constant 0 : i32
    %c0_i32_1 = arith.constant 0 : i32
    return %arg0, %c0_i32, %c0_i32_0 : i32, i32, i32
  }
}

module attributes {stable_mosaic.version = 11 : i64} {
  func.func @_stft_loss_kernel(%arg0: i32, %arg1: memref<32x256xbf16, #tpu.memory_space<vmem>>, %arg2: memref<32x256xbf16, #tpu.memory_space<vmem>>, %arg3: memref<256x256xbf16, #tpu.memory_space<vmem>>, %arg4: memref<1x3x128xf32, #tpu.memory_space<vmem>>) attributes {dimension_semantics = [#tpu.dimension_semantics<parallel>], iteration_bounds = array<i64: 2>, scalar_prefetch = 0 : i64, scratch_operands = 0 : i64, tpu.core_type = #tpu.core_type<tc>, window_params = [{transform_indices = @transform_0, window_bounds = array<i64: 32, 256>}, {transform_indices = @transform_1, window_bounds = array<i64: 32, 256>}, {pipeline_mode = #tpu.pipeline_mode<synchronous>, transform_indices = @transform_2, window_bounds = array<i64: 256, 256>}, {transform_indices = @transform_3, window_bounds = array<i64: 1, 3, 128>}]} {
    %c0 = arith.constant 0 : index
    %c0_0 = arith.constant 0 : index
    %0 = vector.load %arg3[%c0, %c0_0] : memref<256x256xbf16, #tpu.memory_space<vmem>>, vector<256x256xbf16>
    %c0_1 = arith.constant 0 : index
    %c0_2 = arith.constant 0 : index
    %1 = vector.load %arg1[%c0_1, %c0_2] : memref<32x256xbf16, #tpu.memory_space<vmem>>, vector<32x256xbf16>
    %cst = arith.constant dense<0.000000e+00> : vector<32x256xf32>
    %2 = tpu.matmul %1, %0, %cst {dimension_numbers = #tpu.dot_dimension_numbers<[1], [0], [0], [1], [0, 0, 1, 1], [], []>} : vector<32x256xbf16>, vector<256x256xbf16>, vector<32x256xf32> -> vector<32x256xf32>
    %c0_3 = arith.constant 0 : index
    %c0_4 = arith.constant 0 : index
    %3 = vector.load %arg2[%c0_3, %c0_4] : memref<32x256xbf16, #tpu.memory_space<vmem>>, vector<32x256xbf16>
    %cst_5 = arith.constant dense<0.000000e+00> : vector<32x256xf32>
    %4 = tpu.matmul %3, %0, %cst_5 {dimension_numbers = #tpu.dot_dimension_numbers<[1], [0], [0], [1], [0, 0, 1, 1], [], []>} : vector<32x256xbf16>, vector<256x256xbf16>, vector<32x256xf32> -> vector<32x256xf32>
    %5 = vector.extract_strided_slice %2 {offsets = [0, 0], sizes = [32, 128], strides = [1, 1]} : vector<32x256xf32> to vector<32x128xf32>
    %6 = vector.extract_strided_slice %2 {offsets = [0, 128], sizes = [32, 128], strides = [1, 1]} : vector<32x256xf32> to vector<32x128xf32>
    %7 = vector.extract_strided_slice %4 {offsets = [0, 0], sizes = [32, 128], strides = [1, 1]} : vector<32x256xf32> to vector<32x128xf32>
    %8 = vector.extract_strided_slice %4 {offsets = [0, 128], sizes = [32, 128], strides = [1, 1]} : vector<32x256xf32> to vector<32x128xf32>
    %9 = arith.mulf %5, %5 : vector<32x128xf32>
    %10 = arith.mulf %6, %6 : vector<32x128xf32>
    %11 = arith.addf %9, %10 : vector<32x128xf32>
    %cst_6 = arith.constant 1.000000e-07 : f32
    %12 = vector.broadcast %cst_6 : f32 to vector<32x128xf32>
    %13 = arith.maximumf %11, %12 : vector<32x128xf32>
    %14 = arith.mulf %7, %7 : vector<32x128xf32>
    %15 = arith.mulf %8, %8 : vector<32x128xf32>
    %16 = arith.addf %14, %15 : vector<32x128xf32>
    %cst_7 = arith.constant 1.000000e-07 : f32
    %17 = vector.broadcast %cst_7 : f32 to vector<32x128xf32>
    %18 = arith.maximumf %16, %17 : vector<32x128xf32>
    %19 = arith.addf %13, %18 : vector<32x128xf32>
    %20 = arith.mulf %13, %18 : vector<32x128xf32>
    %21 = math.sqrt %20 : vector<32x128xf32>
    %cst_8 = arith.constant 2.000000e+00 : f32
    %22 = vector.broadcast %cst_8 : f32 to vector<32x128xf32>
    %23 = arith.mulf %22, %21 : vector<32x128xf32>
    %24 = arith.subf %19, %23 : vector<32x128xf32>
    %cst_9 = arith.constant 0.000000e+00 : f32
    %25 = vector.broadcast %cst_9 : f32 to vector<32x128xf32>
    %26 = arith.maximumf %24, %25 : vector<32x128xf32>
    %27 = math.log %18 : vector<32x128xf32>
    %28 = math.log %13 : vector<32x128xf32>
    %29 = arith.subf %27, %28 : vector<32x128xf32>
    %30 = math.absf %29 : vector<32x128xf32>
    %cst_10 = arith.constant dense<0.000000e+00> : vector<128xf32>
    %31 = vector.multi_reduction <add>, %26, %cst_10 [0] : vector<32x128xf32> to vector<128xf32>
    %32 = vector.shape_cast %31 : vector<128xf32> to vector<1x128xf32>
    %cst_11 = arith.constant dense<0.000000e+00> : vector<128xf32>
    %33 = vector.multi_reduction <add>, %18, %cst_11 [0] : vector<32x128xf32> to vector<128xf32>
    %34 = vector.shape_cast %33 : vector<128xf32> to vector<1x128xf32>
    %cst_12 = arith.constant dense<0.000000e+00> : vector<128xf32>
    %35 = vector.multi_reduction <add>, %30, %cst_12 [0] : vector<32x128xf32> to vector<128xf32>
    %36 = vector.shape_cast %35 : vector<128xf32> to vector<1x128xf32>
    %cst_13 = arith.constant 5.000000e-01 : f32
    %37 = vector.broadcast %cst_13 : f32 to vector<1x128xf32>
    %38 = arith.mulf %37, %36 : vector<1x128xf32>
    %39 = tpu.concatenate %32, %34, %38 in 0 : vector<1x128xf32>, vector<1x128xf32>, vector<1x128xf32> -> vector<3x128xf32>
    %c0_14 = arith.constant 0 : index
    %c0_15 = arith.constant 0 : index
    %c0_16 = arith.constant 0 : index
    %40 = vector.load %arg4[%c0_14, %c0_15, %c0_16] : memref<1x3x128xf32, #tpu.memory_space<vmem>>, vector<1x3x128xf32>
    %41 = vector.shape_cast %40 : vector<1x3x128xf32> to vector<3x128xf32>
    %42 = vector.shape_cast %39 : vector<3x128xf32> to vector<1x3x128xf32>
    tpu.vector_store %arg4[%c0_14, %c0_15, %c0_16], %42 {strides = array<i32>} : memref<1x3x128xf32, #tpu.memory_space<vmem>>, vector<1x3x128xf32>,
    return
  }
  func.func @transform_0(%arg0: i32) -> (i32, i32) {
    %c0_i32 = arith.constant 0 : i32
    %c0_i32_0 = arith.constant 0 : i32
    return %arg0, %c0_i32 : i32, i32
  }
  func.func @transform_1(%arg0: i32) -> (i32, i32) {
    %c0_i32 = arith.constant 0 : i32
    %c0_i32_0 = arith.constant 0 : i32
    return %arg0, %c0_i32 : i32, i32
  }
  func.func @transform_2(%arg0: i32) -> (i32, i32) {
    %c0_i32 = arith.constant 0 : i32
    %c0_i32_0 = arith.constant 0 : i32
    %c0_i32_1 = arith.constant 0 : i32
    return %c0_i32, %c0_i32_0 : i32, i32
  }
  func.func @transform_3(%arg0: i32) -> (i32, i32, i32) {
    %c0_i32 = arith.constant 0 : i32
    %c0_i32_0 = arith.constant 0 : i32
    %c0_i32_1 = arith.constant 0 : i32
    return %arg0, %c0_i32, %c0_i32_0 : i32, i32, i32
  }
}

module attributes {stable_mosaic.version = 11 : i64} {
  func.func @_stft_loss_kernel(%arg0: i32, %arg1: memref<32x128xbf16, #tpu.memory_space<vmem>>, %arg2: memref<32x128xbf16, #tpu.memory_space<vmem>>, %arg3: memref<128x256xbf16, #tpu.memory_space<vmem>>, %arg4: memref<1x3x128xf32, #tpu.memory_space<vmem>>) attributes {dimension_semantics = [#tpu.dimension_semantics<parallel>], iteration_bounds = array<i64: 3>, scalar_prefetch = 0 : i64, scratch_operands = 0 : i64, tpu.core_type = #tpu.core_type<tc>, window_params = [{transform_indices = @transform_0, window_bounds = array<i64: 32, 128>}, {transform_indices = @transform_1, window_bounds = array<i64: 32, 128>}, {pipeline_mode = #tpu.pipeline_mode<synchronous>, transform_indices = @transform_2, window_bounds = array<i64: 128, 256>}, {transform_indices = @transform_3, window_bounds = array<i64: 1, 3, 128>}]} {
    %c0 = arith.constant 0 : index
    %c0_0 = arith.constant 0 : index
    %0 = vector.load %arg3[%c0, %c0_0] : memref<128x256xbf16, #tpu.memory_space<vmem>>, vector<128x256xbf16>
    %c0_1 = arith.constant 0 : index
    %c0_2 = arith.constant 0 : index
    %1 = vector.load %arg1[%c0_1, %c0_2] : memref<32x128xbf16, #tpu.memory_space<vmem>>, vector<32x128xbf16>
    %cst = arith.constant dense<0.000000e+00> : vector<32x256xf32>
    %2 = tpu.matmul %1, %0, %cst {dimension_numbers = #tpu.dot_dimension_numbers<[1], [0], [0], [1], [0, 0, 1, 1], [], []>} : vector<32x128xbf16>, vector<128x256xbf16>, vector<32x256xf32> -> vector<32x256xf32>
    %c0_3 = arith.constant 0 : index
    %c0_4 = arith.constant 0 : index
    %3 = vector.load %arg2[%c0_3, %c0_4] : memref<32x128xbf16, #tpu.memory_space<vmem>>, vector<32x128xbf16>
    %cst_5 = arith.constant dense<0.000000e+00> : vector<32x256xf32>
    %4 = tpu.matmul %3, %0, %cst_5 {dimension_numbers = #tpu.dot_dimension_numbers<[1], [0], [0], [1], [0, 0, 1, 1], [], []>} : vector<32x128xbf16>, vector<128x256xbf16>, vector<32x256xf32> -> vector<32x256xf32>
    %5 = vector.extract_strided_slice %2 {offsets = [0, 0], sizes = [32, 128], strides = [1, 1]} : vector<32x256xf32> to vector<32x128xf32>
    %6 = vector.extract_strided_slice %2 {offsets = [0, 128], sizes = [32, 128], strides = [1, 1]} : vector<32x256xf32> to vector<32x128xf32>
    %7 = vector.extract_strided_slice %4 {offsets = [0, 0], sizes = [32, 128], strides = [1, 1]} : vector<32x256xf32> to vector<32x128xf32>
    %8 = vector.extract_strided_slice %4 {offsets = [0, 128], sizes = [32, 128], strides = [1, 1]} : vector<32x256xf32> to vector<32x128xf32>
    %9 = arith.mulf %5, %5 : vector<32x128xf32>
    %10 = arith.mulf %6, %6 : vector<32x128xf32>
    %11 = arith.addf %9, %10 : vector<32x128xf32>
    %cst_6 = arith.constant 1.000000e-07 : f32
    %12 = vector.broadcast %cst_6 : f32 to vector<32x128xf32>
    %13 = arith.maximumf %11, %12 : vector<32x128xf32>
    %14 = arith.mulf %7, %7 : vector<32x128xf32>
    %15 = arith.mulf %8, %8 : vector<32x128xf32>
    %16 = arith.addf %14, %15 : vector<32x128xf32>
    %cst_7 = arith.constant 1.000000e-07 : f32
    %17 = vector.broadcast %cst_7 : f32 to vector<32x128xf32>
    %18 = arith.maximumf %16, %17 : vector<32x128xf32>
    %19 = arith.addf %13, %18 : vector<32x128xf32>
    %20 = arith.mulf %13, %18 : vector<32x128xf32>
    %21 = math.sqrt %20 : vector<32x128xf32>
    %cst_8 = arith.constant 2.000000e+00 : f32
    %22 = vector.broadcast %cst_8 : f32 to vector<32x128xf32>
    %23 = arith.mulf %22, %21 : vector<32x128xf32>
    %24 = arith.subf %19, %23 : vector<32x128xf32>
    %cst_9 = arith.constant 0.000000e+00 : f32
    %25 = vector.broadcast %cst_9 : f32 to vector<32x128xf32>
    %26 = arith.maximumf %24, %25 : vector<32x128xf32>
    %27 = math.log %18 : vector<32x128xf32>
    %28 = math.log %13 : vector<32x128xf32>
    %29 = arith.subf %27, %28 : vector<32x128xf32>
    %30 = math.absf %29 : vector<32x128xf32>
    %cst_10 = arith.constant dense<0.000000e+00> : vector<128xf32>
    %31 = vector.multi_reduction <add>, %26, %cst_10 [0] : vector<32x128xf32> to vector<128xf32>
    %32 = vector.shape_cast %31 : vector<128xf32> to vector<1x128xf32>
    %cst_11 = arith.constant dense<0.000000e+00> : vector<128xf32>
    %33 = vector.multi_reduction <add>, %18, %cst_11 [0] : vector<32x128xf32> to vector<128xf32>
    %34 = vector.shape_cast %33 : vector<128xf32> to vector<1x128xf32>
    %cst_12 = arith.constant dense<0.000000e+00> : vector<128xf32>
    %35 = vector.multi_reduction <add>, %30, %cst_12 [0] : vector<32x128xf32> to vector<128xf32>
    %36 = vector.shape_cast %35 : vector<128xf32> to vector<1x128xf32>
    %cst_13 = arith.constant 5.000000e-01 : f32
    %37 = vector.broadcast %cst_13 : f32 to vector<1x128xf32>
    %38 = arith.mulf %37, %36 : vector<1x128xf32>
    %39 = tpu.concatenate %32, %34, %38 in 0 : vector<1x128xf32>, vector<1x128xf32>, vector<1x128xf32> -> vector<3x128xf32>
    %c0_14 = arith.constant 0 : index
    %c0_15 = arith.constant 0 : index
    %c0_16 = arith.constant 0 : index
    %40 = vector.load %arg4[%c0_14, %c0_15, %c0_16] : memref<1x3x128xf32, #tpu.memory_space<vmem>>, vector<1x3x128xf32>
    %41 = vector.shape_cast %40 : vector<1x3x128xf32> to vector<3x128xf32>
    %42 = vector.shape_cast %39 : vector<3x128xf32> to vector<1x3x128xf32>
    tpu.vector_store %arg4[%c0_14, %c0_15, %c0_16], %42 {strides = array<i32>} : memref<1x3x128xf32, #tpu.memory_space<vmem>>, vector<1x3x128xf32>,
    return
  }
  func.func @transform_0(%arg0: i32) -> (i32, i32) {
    %c0_i32 = arith.constant 0 : i32
    %c0_i32_0 = arith.constant 0 : i32
    return %arg0, %c0_i32 : i32, i32
  }
  func.func @transform_1(%arg0: i32) -> (i32, i32) {
    %c0_i32 = arith.constant 0 : i32
    %c0_i32_0 = arith.constant 0 : i32
    return %arg0, %c0_i32 : i32, i32
  }
  func.func @transform_2(%arg0: i32) -> (i32, i32) {
    %c0_i32 = arith.constant 0 : i32
    %c0_i32_0 = arith.constant 0 : i32
    %c0_i32_1 = arith.constant 0 : i32
    return %c0_i32, %c0_i32_0 : i32, i32
  }
  func.func @transform_3(%arg0: i32) -> (i32, i32, i32) {
    %c0_i32 = arith.constant 0 : i32
    %c0_i32_0 = arith.constant 0 : i32
    %c0_i32_1 = arith.constant 0 : i32
    return %arg0, %c0_i32, %c0_i32_0 : i32, i32, i32
  }
}

</mosaic_0001>

<bundles_post_ra>
// kernel: _forward_impl.4
= control target key start
LH: loop header
LB: loop body
LE: loop exit
PB: predicated region body
PF: predicated region fallthrough
CT: control target
= control target key end

     0   :  { %vm1460_vm12 = vcmask 1040384   ;;  %vm1462_vm13 = vcmask 1041408   ;;  %s2988_s2 = inlined_call_operand.vmem [shape: bf16[512,512], index: 2, kind: input, shape index: {}]   ;;  %s2989_s0 = inlined_call_operand.vmem [shape: bf16[24,512], index: 0, kind: input, shape index: {}]   ;;  %s2990_s1 = inlined_call_operand.vmem [shape: bf16[24,512], index: 1, kind: input, shape index: {}]   ;;  %s2991_s3 = inlined_call_operand.vmem [shape: f32[1,3,128], index: 3, kind: output, shape index: {}]  }
   0x1   :  { %v1884_v0 = vld [vmem:[%s2988_s2 + $0xe4] ss:$16 sps:$4 sm:$0xff]   ;;  %v1895_v2 = vld [vmem:[%s2988_s2 + $0xe0] ss:$16 sps:$4 sm:$0xff]   ;;  %v2185_v51 = vld [vmem:[%s2989_s0 + $0xc] ss:$16 sps:$4 sm:$0xff]  }
   0x2   :  { %v1889_v1 = vld [vmem:[%s2988_s2 + $0x2e4] ss:$16 sps:$4 sm:$0xff]   ;;  %822 = vmatprep.subr.bf16.mxu0 %v1884_v0  ;;  %v1900_v3 = vld [vmem:[%s2988_s2 + $0x2e0] ss:$16 sps:$4 sm:$0xff]   ;;  %905 = vmatprep.mubr.bf16.mxu1 %v2185_v51 }
   0x3   :  { %873 = vmatprep.subr.bf16.mxu1 %v1889_v1  ;;  %v1906_v4 = vld [vmem:[%s2988_s2 + $0xc4] ss:$16 sps:$4 sm:$0xff]   ;;  %823 = vmatpush1.bf16.msra.mxu0 %v1895_v2  ;;  %v1918_v6 = vld [vmem:[%s2988_s2 + $0xc0] ss:$16 sps:$4 sm:$0xff]  }
   0x4   :  { %874 = vmatpush1.bf16.msra.mxu1 %v1900_v3  ;;  %v1913_v5 = vld [vmem:[%s2988_s2 + $0x2c4] ss:$16 sps:$4 sm:$0xff]   ;;  %824 = vmatprep.subr.bf16.mxu0 %v1906_v4  ;;  %v1924_v7 = vld [vmem:[%s2988_s2 + $0x2c0] ss:$16 sps:$4 sm:$0xff]  }
   0x5   :  { %875 = vmatprep.subr.bf16.mxu1 %v1913_v5  ;;  %v1930_v8 = vld [vmem:[%s2988_s2 + $0xa4] ss:$16 sps:$4 sm:$0xff]   ;;  %v1940_v10 = vld [vmem:[%s2988_s2 + $0xa0] ss:$16 sps:$4 sm:$0xff]  }
   0x6   :  { %v1935_v9 = vld [vmem:[%s2988_s2 + $0x2a4] ss:$16 sps:$4 sm:$0xff]   ;;  %v1945_v11 = vld [vmem:[%s2988_s2 + $0x2a0] ss:$16 sps:$4 sm:$0xff]  }
   0x7   :  { %825 = vmatpush1.bf16.msra.mxu0 %v1918_v6  ;;  %v1952_v12 = vld [vmem:[%s2988_s2 + $0x84] ss:$16 sps:$4 sm:$0xff]   ;;  %v1964_v14 = vld [vmem:[%s2988_s2 + $0x80] ss:$16 sps:$4 sm:$0xff]  }
   0x8   :  { %876 = vmatpush1.bf16.msra.mxu1 %v1924_v7  ;;  %826 = vmatprep.subr.bf16.mxu0 %v1930_v8  ;;  %v1959_v13 = vld [vmem:[%s2988_s2 + $0x284] ss:$16 sps:$4 sm:$0xff]   ;;  %v1971_v15 = vld [vmem:[%s2988_s2 + $0x280] ss:$16 sps:$4 sm:$0xff]  }
   0x9   :  { %877 = vmatprep.subr.bf16.mxu1 %v1935_v9  ;;  %v1976_v16 = vld [vmem:[%s2988_s2 + $0x64] ss:$16 sps:$4 sm:$0xff]   ;;  %v1988_v18 = vld [vmem:[%s2988_s2 + $0x60] ss:$16 sps:$4 sm:$0xff]  }
   0xa   :  { %v1983_v17 = vld [vmem:[%s2988_s2 + $0x264] ss:$16 sps:$4 sm:$0xff]   ;;  %v1993_v19 = vld [vmem:[%s2988_s2 + $0x260] ss:$16 sps:$4 sm:$0xff]  }
   0xb   :  { %827 = vmatpush1.bf16.msra.mxu0 %v1940_v10  ;;  %v2000_v20 = vld [vmem:[%s2988_s2 + $0x44] ss:$16 sps:$4 sm:$0xff]   ;;  %v2012_v22 = vld [vmem:[%s2988_s2 + $0x40] ss:$16 sps:$4 sm:$0xff]  }
   0xc   :  { %878 = vmatpush1.bf16.msra.mxu1 %v1945_v11  ;;  %828 = vmatprep.subr.bf16.mxu0 %v1952_v12  ;;  %v2007_v21 = vld [vmem:[%s2988_s2 + $0x244] ss:$16 sps:$4 sm:$0xff]   ;;  %v2019_v23 = vld [vmem:[%s2988_s2 + $0x240] ss:$16 sps:$4 sm:$0xff]  }
   0xd   :  { %879 = vmatprep.subr.bf16.mxu1 %v1959_v13  ;;  %v2024_v24 = vld [vmem:[%s2988_s2 + $0x24] ss:$16 sps:$4 sm:$0xff]   ;;  %v2036_v26 = vld [vmem:[%s2988_s2 + $0x20] ss:$16 sps:$4 sm:$0xff]  }
   0xe   :  { %v2031_v25 = vld [vmem:[%s2988_s2 + $0x224] ss:$16 sps:$4 sm:$0xff]   ;;  %v2041_v27 = vld [vmem:[%s2988_s2 + $0x220] ss:$16 sps:$4 sm:$0xff]  }
   0xf   :  { %829 = vmatpush1.bf16.msra.mxu0 %v1964_v14  ;;  %v2048_v28 = vld [vmem:[%s2988_s2 + $0x4] ss:$16 sps:$4 sm:$0xff]   ;;  %v2060_v30 = vld [vmem:[%s2988_s2] ss:$16 sps:$4 sm:$0xff]  }
  0x10   :  { %880 = vmatpush1.bf16.msra.mxu1 %v1971_v15  ;;  %830 = vmatprep.subr.bf16.mxu0 %v1976_v16  ;;  %v2055_v29 = vld [vmem:[%s2988_s2 + $0x204] ss:$16 sps:$4 sm:$0xff]   ;;  %v2067_v31 = vld [vmem:[%s2988_s2 + $0x200] ss:$16 sps:$4 sm:$0xff]  }
  0x11   :  { %881 = vmatprep.subr.bf16.mxu1 %v1983_v17  ;;  %v2072_v32 = vld [vmem:[%s2988_s2 + $0x1e4] ss:$16 sps:$4 sm:$0xff]   ;;  %v2084_v34 = vld [vmem:[%s2988_s2 + $0x1e0] ss:$16 sps:$4 sm:$0xff]  }
  0x12   :  { %v2079_v33 = vld [vmem:[%s2988_s2 + $0x3e4] ss:$16 sps:$4 sm:$0xff]   ;;  %v2089_v35 = vld [vmem:[%s2988_s2 + $0x3e0] ss:$16 sps:$4 sm:$0xff]  }
  0x13   :  { %831 = vmatpush1.bf16.msra.mxu0 %v1988_v18  ;;  %v2096_v36 = vld [vmem:[%s2988_s2 + $0x1c4] ss:$16 sps:$4 sm:$0xff]   ;;  %v2108_v38 = vld [vmem:[%s2988_s2 + $0x1c0] ss:$16 sps:$4 sm:$0xff]  }
  0x14   :  { %882 = vmatpush1.bf16.msra.mxu1 %v1993_v19  ;;  %832 = vmatprep.subr.bf16.mxu0 %v2000_v20  ;;  %v2103_v37 = vld [vmem:[%s2988_s2 + $0x3c4] ss:$16 sps:$4 sm:$0xff]   ;;  %v2115_v39 = vld [vmem:[%s2988_s2 + $0x3c0] ss:$16 sps:$4 sm:$0xff]  }
  0x15   :  { %883 = vmatprep.subr.bf16.mxu1 %v2007_v21  ;;  %v2120_v40 = vld [vmem:[%s2988_s2 + $0x1a4] ss:$16 sps:$4 sm:$0xff]   ;;  %v2132_v42 = vld [vmem:[%s2988_s2 + $0x1a0] ss:$16 sps:$4 sm:$0xff]  }
  0x16   :  { %v2127_v41 = vld [vmem:[%s2988_s2 + $0x3a4] ss:$16 sps:$4 sm:$0xff]   ;;  %v2137_v43 = vld [vmem:[%s2988_s2 + $0x3a0] ss:$16 sps:$4 sm:$0xff]  }
  0x17   :  { %833 = vmatpush1.bf16.msra.mxu0 %v2012_v22  ;;  %v2144_v44 = vld [vmem:[%s2988_s2 + $0x184] ss:$16 sps:$4 sm:$0xff]   ;;  %v2156_v46 = vld [vmem:[%s2988_s2 + $0x180] ss:$16 sps:$4 sm:$0xff]  }
  0x18   :  { %884 = vmatpush1.bf16.msra.mxu1 %v2019_v23  ;;  %834 = vmatprep.subr.bf16.mxu0 %v2024_v24  ;;  %v2151_v45 = vld [vmem:[%s2988_s2 + $0x384] ss:$16 sps:$4 sm:$0xff]   ;;  %v2161_v47 = vld [vmem:[%s2988_s2 + $0x380] ss:$16 sps:$4 sm:$0xff]  }
  0x19   :  { %885 = vmatprep.subr.bf16.mxu1 %v2031_v25  ;;  %v2166_v48 = vld [vmem:[%s2988_s2 + $0x164] ss:$16 sps:$4 sm:$0xff]   ;;  %v2191_v52 = vld [vmem:[%s2988_s2 + $0x160] ss:$16 sps:$4 sm:$0xff]  }
  0x1a   :  { %3062 = vst [vmem:[#allocation2_spill] sm:$0xff] %v2166_v48  ;;  %v2171_v49 = vld [vmem:[%s2989_s0 + $0x4] ss:$16 sps:$4 sm:$0xff]   ;;  %3064 = vst [vmem:[#allocation4_spill] sm:$0xff] %v2191_v52  ;;  %v2196_v53 = vld [vmem:[%s2988_s2 + $0x360] ss:$16 sps:$4 sm:$0xff]  }
  0x1b   :  { %835 = vmatpush1.bf16.msra.mxu0 %v2036_v26  ;;  %v2178_v50 = vld [vmem:[%s2988_s2 + $0x364] ss:$16 sps:$4 sm:$0xff]   ;;  %854 = vmatprep.mubr.bf16.mxu0 %v2171_v49  ;;  %3065 = vst [vmem:[#allocation5_spill] sm:$0xff] %v2196_v53  ;;  %v2216_v56 = vld [vmem:[%s2988_s2 + $0x140] ss:$16 sps:$4 sm:$0xff]  }
  0x1c   :  { %886 = vmatpush1.bf16.msra.mxu1 %v2041_v27  ;;  %836 = vmatprep.subr.bf16.mxu0 %v2048_v28  ;;  %3063 = vst [vmem:[#allocation3_spill] sm:$0xff] %v2178_v50  ;;  %v2204_v54 = vld [vmem:[%s2988_s2 + $0x144] ss:$16 sps:$4 sm:$0xff]   ;;  %3068 = vst [vmem:[#allocation8_spill] sm:$0xff] %v2216_v56  ;;  %v2221_v57 = vld [vmem:[%s2988_s2 + $0x340] ss:$16 sps:$4 sm:$0xff]  }
  0x1d   :  { %887 = vmatprep.subr.bf16.mxu1 %v2055_v29  ;;  %3066 = vst [vmem:[#allocation6_spill] sm:$0xff] %v2204_v54  ;;  %v2211_v55 = vld [vmem:[%s2988_s2 + $0x344] ss:$16 sps:$4 sm:$0xff]   ;;  %3069 = vst [vmem:[#allocation9_spill] sm:$0xff] %v2221_v57  ;;  %v2240_v60 = vld [vmem:[%s2988_s2 + $0x120] ss:$16 sps:$4 sm:$0xff]  }
  0x1e   :  { %3067 = vst [vmem:[#allocation7_spill] sm:$0xff] %v2211_v55  ;;  %v2228_v58 = vld [vmem:[%s2988_s2 + $0x124] ss:$16 sps:$4 sm:$0xff]   ;;  %3072 = vst [vmem:[#allocation12_spill] sm:$0xff] %v2240_v60  ;;  %v2245_v61 = vld [vmem:[%s2988_s2 + $0x320] ss:$16 sps:$4 sm:$0xff]  }
  0x1f   :  { %837 = vmatpush1.bf16.msra.mxu0 %v2060_v30  ;;  %3070 = vst [vmem:[#allocation10_spill] sm:$0xff] %v2228_v58  ;;  %v2235_v59 = vld [vmem:[%s2988_s2 + $0x324] ss:$16 sps:$4 sm:$0xff]   ;;  %3073 = vst [vmem:[#allocation13_spill] sm:$0xff] %v2245_v61 }
  0x20   :  { %888 = vmatpush1.bf16.msra.mxu1 %v2067_v31  ;;  %838 = vmatprep.subr.bf16.mxu0 %v2072_v32  ;;  %3071 = vst [vmem:[#allocation11_spill] sm:$0xff] %v2235_v59  ;;  %v2252_v62 = vld [vmem:[%s2988_s2 + $0x104] ss:$16 sps:$4 sm:$0xff]  }
  0x21   :  { %889 = vmatprep.subr.bf16.mxu1 %v2079_v33  ;;  %3074 = vst [vmem:[#allocation14_spill] sm:$0xff] %v2252_v62  ;;  %v2259_v63 = vld [vmem:[%s2988_s2 + $0x304] ss:$16 sps:$4 sm:$0xff]  }
  0x22   :  { %3075 = vst [vmem:[#allocation15_spill] sm:$0xff] %v2259_v63 }
  0x23   :  { %839 = vmatpush2.bf16.msra.mxu0 %v2084_v34 }
  0x24   :  { %890 = vmatpush2.bf16.msra.mxu1 %v2089_v35  ;;  %840 = vmatprep.subr.bf16.mxu0 %v2096_v36 }
  0x25   :  { %891 = vmatprep.subr.bf16.mxu1 %v2103_v37 }
  0x27   :  { %841 = vmatpush2.bf16.msra.mxu0 %v2108_v38 }
  0x28   :  { %892 = vmatpush2.bf16.msra.mxu1 %v2115_v39  ;;  %842 = vmatprep.subr.bf16.mxu0 %v2120_v40 }
  0x29   :  { %893 = vmatprep.subr.bf16.mxu1 %v2127_v41 }
  0x2b   :  { %843 = vmatpush2.bf16.msra.mxu0 %v2132_v42 }
  0x2c   :  { %894 = vmatpush2.bf16.msra.mxu1 %v2137_v43  ;;  %844 = vmatprep.subr.bf16.mxu0 %v2144_v44 }
  0x2d   :  { %895 = vmatprep.subr.bf16.mxu1 %v2151_v45 }
  0x2f   :  { %845 = vmatpush2.bf16.msra.mxu0 %v2156_v46 }
  0x30   :  { %896 = vmatpush2.bf16.msra.mxu1 %v2161_v47  ;;  %846 = vmatprep.subr.bf16.mxu0 %v2166_v48 }
  0x31   :  { %897 = vmatprep.subr.bf16.mxu1 %v2178_v50 }
  0x33   :  { %847 = vmatpush2.bf16.msra.mxu0 %v2191_v52 }
  0x34   :  { %898 = vmatpush2.bf16.msra.mxu1 %v2196_v53  ;;  %848 = vmatprep.subr.bf16.mxu0 %v2204_v54  ;;  %v2317_v54 = vld [vmem:[%s2988_s2 + $0x2cc] ss:$16 sps:$4 sm:$0xff]  }
  0x35   :  { %899 = vmatprep.subr.bf16.mxu1 %v2211_v55  ;;  %v2310_v55 = vld [vmem:[%s2988_s2 + $0xcc] ss:$16 sps:$4 sm:$0xff]   ;;  %3083 = vst [vmem:[#allocation23_spill] sm:$0xff] %v2317_v54 }
  0x36   :  { %3082 = vst [vmem:[#allocation22_spill] sm:$0xff] %v2310_v55  ;;  %v2416_v53 = vld [vmem:[%s2988_s2 + $0x4c] ss:$16 sps:$4 sm:$0xff]  }
  0x37   :  { %849 = vmatpush2.bf16.msra.mxu0 %v2216_v56  ;;  %v2264_v56 = vld [vmem:[%s2988_s2 + $0x100] ss:$16 sps:$4 sm:$0xff]   ;;  %3096 = vst [vmem:[#allocation36_spill] sm:$0xff] %v2416_v53 }
  0x38   :  { %900 = vmatpush2.bf16.msra.mxu1 %v2221_v57  ;;  %850 = vmatprep.subr.bf16.mxu0 %v2228_v58  ;;  %3076 = vst [vmem:[#allocation16_spill] sm:$0xff] %v2264_v56  ;;  %v2269_v57 = vld [vmem:[%s2988_s2 + $0x300] ss:$16 sps:$4 sm:$0xff]   ;;  %v2283_v58 = vld [vmem:[%s2988_s2 + $0x2ec] ss:$16 sps:$4 sm:$0xff]  }
  0x39   :  { %901 = vmatprep.subr.bf16.mxu1 %v2235_v59  ;;  %3077 = vst [vmem:[#allocation17_spill] sm:$0xff] %v2269_v57  ;;  %v2276_v59 = vld [vmem:[%s2988_s2 + $0xec] ss:$16 sps:$4 sm:$0xff]   ;;  %3079 = vst [vmem:[#allocation19_spill] sm:$0xff] %v2283_v58 }
  0x3a   :  { %3078 = vst [vmem:[#allocation18_spill] sm:$0xff] %v2276_v59 }
  0x3b   :  { %851 = vmatpush2.bf16.msra.mxu0 %v2240_v60  ;;  %v2288_v60 = vld [vmem:[%s2989_s0] ss:$16 sps:$4 sm:$0xff]  }
  0x3c   :  { %902 = vmatpush2.bf16.msra.mxu1 %v2245_v61  ;;  %852 = vmatprep.subr.bf16.mxu0 %v2252_v62  ;;  %v2293_v61 = vld [vmem:[%s2989_s0 + $0x8] ss:$16 sps:$4 sm:$0xff]  }
  0x3d   :  { %903 = vmatprep.subr.bf16.mxu1 %v2259_v63  ;;  %v2298_v62 = vld [vmem:[%s2988_s2 + $0xe8] ss:$16 sps:$4 sm:$0xff]  }
  0x3e   :  { %3080 = vst [vmem:[#allocation20_spill] sm:$0xff] %v2298_v62  ;;  %v2303_v63 = vld [vmem:[%s2988_s2 + $0x2e8] ss:$16 sps:$4 sm:$0xff]  }
  0x3f   :  { %3081 = vst [vmem:[#allocation21_spill] sm:$0xff] %v2303_v63  ;;  %853 = vmatpush2.bf16.msra.mxu0 %v2264_v56  ;;  %v2343_v56 = vld [vmem:[%s2988_s2 + $0x2ac] ss:$16 sps:$4 sm:$0xff]  }
  0x40   :  { %904 = vmatpush2.bf16.msra.mxu1 %v2269_v57  ;;  %924 = vmatprep.subr.bf16.mxu0 %v2276_v59  ;;  %v2324_v57 = vld [vmem:[%s2988_s2 + $0xc8] ss:$16 sps:$4 sm:$0xff]   ;;  %3087 = vst [vmem:[#allocation27_spill] sm:$0xff] %v2343_v56 }
  0x41   :  { %975 = vmatprep.subr.bf16.mxu1 %v2283_v58  ;;  %3084 = vst [vmem:[#allocation24_spill] sm:$0xff] %v2324_v57  ;;  %v2329_v59 = vld [vmem:[%s2988_s2 + $0x2c8] ss:$16 sps:$4 sm:$0xff]   ;;  %v2336_v58 = vld [vmem:[%s2988_s2 + $0xac] ss:$16 sps:$4 sm:$0xff]  }
  0x42   :  { %855 = vmatmul.mubr.bf16.vlgmr.msra.gmra.mxu0 %v2288_v60  ;;  %3085 = vst [vmem:[#allocation25_spill] sm:$0xff] %v2329_v59  ;;  %3086 = vst [vmem:[#allocation26_spill] sm:$0xff] %v2336_v58 }
  0x43   :  { %906 = vmatmul.mubr.bf16.vlgmr.msra.gmra.mxu1 %v2293_v61  ;;  %925 = vmatpush1.bf16.msra.mxu0 %v2298_v62  ;;  %v2348_v62 = vld [vmem:[%s2988_s2 + $0xa8] ss:$16 sps:$4 sm:$0xff]  }
  0x44   :  { %976 = vmatpush1.bf16.msra.mxu1 %v2303_v63  ;;  %926 = vmatprep.subr.bf16.mxu0 %v2310_v55  ;;  %3088 = vst [vmem:[#allocation28_spill] sm:$0xff] %v2348_v62  ;;  %v2353_v63 = vld [vmem:[%s2988_s2 + $0x2a8] ss:$16 sps:$4 sm:$0xff]   ;;  %v2367_v55 = vld [vmem:[%s2988_s2 + $0x28c] ss:$16 sps:$4 sm:$0xff]  }
  0x45   :  { %977 = vmatprep.subr.bf16.mxu1 %v2317_v54  ;;  %3089 = vst [vmem:[#allocation29_spill] sm:$0xff] %v2353_v63  ;;  %v2360_v54 = vld [vmem:[%s2988_s2 + $0x8c] ss:$16 sps:$4 sm:$0xff]   ;;  %3091 = vst [vmem:[#allocation31_spill] sm:$0xff] %v2367_v55 }
  0x46   :  { %3090 = vst [vmem:[#allocation30_spill] sm:$0xff] %v2360_v54 }
  0x47   :  { %927 = vmatpush1.bf16.msra.mxu0 %v2324_v57  ;;  %v2372_v57 = vld [vmem:[%s2988_s2 + $0x88] ss:$16 sps:$4 sm:$0xff]  }
  0x48   :  { %978 = vmatpush1.bf16.msra.mxu1 %v2329_v59  ;;  %928 = vmatprep.subr.bf16.mxu0 %v2336_v58  ;;  %3092 = vst [vmem:[#allocation32_spill] sm:$0xff] %v2372_v57  ;;  %v2377_v59 = vld [vmem:[%s2988_s2 + $0x288] ss:$16 sps:$4 sm:$0xff]   ;;  %v2391_v58 = vld [vmem:[%s2988_s2 + $0x26c] ss:$16 sps:$4 sm:$0xff]  }
  0x49   :  { %979 = vmatprep.subr.bf16.mxu1 %v2343_v56  ;;  %3093 = vst [vmem:[#allocation33_spill] sm:$0xff] %v2377_v59  ;;  %v2384_v56 = vld [vmem:[%s2988_s2 + $0x6c] ss:$16 sps:$4 sm:$0xff]   ;;  %3094 = vst [vmem:[#allocation34_spill] sm:$0xff] %v2391_v58 }
  0x4b   :  { %929 = vmatpush1.bf16.msra.mxu0 %v2348_v62  ;;  %v2396_v62 = vld [vmem:[%s2988_s2 + $0x68] ss:$16 sps:$4 sm:$0xff]  }
  0x4c   :  { %980 = vmatpush1.bf16.msra.mxu1 %v2353_v63  ;;  %930 = vmatprep.subr.bf16.mxu0 %v2360_v54  ;;  %v2401_v63 = vld [vmem:[%s2988_s2 + $0x268] ss:$16 sps:$4 sm:$0xff]  }
  0x4d   :  { %981 = vmatprep.subr.bf16.mxu1 %v2367_v55  ;;  %3095 = vst [vmem:[#allocation35_spill] sm:$0xff] %v2401_v63  ;;  %v146_v55 = vld [vmem:[%s2989_s0 + $0x20] sm:$0xff]  ;;  %v147_v54 = vld [vmem:[%s2989_s0 + $0x28] sm:$0xff] }
  0x4e   :  { %v2425_v52 = vcombine.high %v147_v54, %v147_v54  ;;  %v2427_v50 = vcombine.low %v146_v55, %v146_v55  ;;  %v2429_v48 = vcombine.low %v147_v54, %v147_v54  ;;  %v2450_v54 = vld [vmem:[%s2988_s2 + $0x2c] ss:$16 sps:$4 sm:$0xff]  }
  0x4f   :  { %931 = vmatpush1.bf16.msra.mxu0 %v2372_v57  ;;  %v2423_v57 = vcombine.high %v146_v55, %v146_v55  ;;  %v2443_v55 = vld [vmem:[%s2988_s2 + $0x248] ss:$16 sps:$4 sm:$0xff]   ;;  %3098 = vst [vmem:[#allocation38_spill] sm:$0xff] %v2450_v54 }
  0x50   :  { %982 = vmatpush1.bf16.msra.mxu1 %v2377_v59  ;;  %932 = vmatprep.subr.bf16.mxu0 %v2384_v56  ;;  %v2421_v59 = vld [vmem:[%s2988_s2 + $0x24c] ss:$16 sps:$4 sm:$0xff]  }
  0x51   :  { %983 = vmatprep.subr.bf16.mxu1 %v2391_v58  ;;  %3097 = vst [vmem:[#allocation37_spill] sm:$0xff] %v2421_v59  ;;  %864 = vmatprep.mubr.bf16.mxu0 %v2423_v57  ;;  %v2438_v58 = vld [vmem:[%s2988_s2 + $0x48] ss:$16 sps:$4 sm:$0xff]  }
  0x52   :  { %915 = vmatprep.mubr.bf16.mxu1 %v2425_v52  ;;  %865 = vmatmul.mubr.bf16.gmra.mxu0 %v2427_v50 }
  0x53   :  { %933 = vmatpush1.bf16.msra.mxu0 %v2396_v62  ;;  %916 = vmatmul.mubr.bf16.gmra.mxu1 %v2429_v48 }
  0x54   :  { %984 = vmatpush1.bf16.msra.mxu1 %v2401_v63  ;;  %934 = vmatprep.subr.bf16.mxu0 %v2416_v53  ;;  %v2455_v63 = vld [vmem:[%s2988_s2 + $0x22c] ss:$16 sps:$4 sm:$0xff]   ;;  %v2471_v53 = vld [vmem:[%s2988_s2 + $0x228] ss:$16 sps:$4 sm:$0xff]  }
  0x55   :  { %985 = vmatprep.subr.bf16.mxu1 %v2421_v59  ;;  %3099 = vst [vmem:[#allocation39_spill] sm:$0xff] %v2455_v63  ;;  %956 = vmatprep.mubr.bf16.mxu0 %v2171_v49  ;;  %v2466_v59 = vld [vmem:[%s2988_s2 + $0x28] ss:$16 sps:$4 sm:$0xff]   ;;  %3101 = vst [vmem:[#allocation41_spill] sm:$0xff] %v2471_v53  ;;  %v2478_v49 = vld [vmem:[%s2988_s2 + $0xc] ss:$16 sps:$4 sm:$0xff]  }
  0x56   :  { %1007 = vmatprep.mubr.bf16.mxu1 %v2185_v51  ;;  %3100 = vst [vmem:[#allocation40_spill] sm:$0xff] %v2466_v59  ;;  %3102 = vst [vmem:[#allocation42_spill] sm:$0xff] %v2478_v49  ;;  %v2483_v51 = vld [vmem:[%s2988_s2 + $0x20c] ss:$16 sps:$4 sm:$0xff]  }
  0x57   :  { %935 = vmatpush1.bf16.msra.mxu0 %v2438_v58  ;;  %3103 = vst [vmem:[#allocation43_spill] sm:$0xff] %v2483_v51 }
  0x58   :  { %986 = vmatpush1.bf16.msra.mxu1 %v2443_v55  ;;  %936 = vmatprep.subr.bf16.mxu0 %v2450_v54  ;;  %v2490_v54 = vld [vmem:[%s2988_s2 + $0x8] ss:$16 sps:$4 sm:$0xff]  }
  0x59   :  { %987 = vmatprep.subr.bf16.mxu1 %v2455_v63  ;;  %3104 = vst [vmem:[#allocation44_spill] sm:$0xff] %v2490_v54  ;;  %v2495_v63 = vld [vmem:[%s2988_s2 + $0x208] ss:$16 sps:$4 sm:$0xff]  }
  0x5a   :  { %3105 = vst [vmem:[#allocation45_spill] sm:$0xff] %v2495_v63 }
  0x5b   :  { %937 = vmatpush1.bf16.msra.mxu0 %v2466_v59  ;;  %v2502_v59 = vld [vmem:[%s2988_s2 + $0x1ec] ss:$16 sps:$4 sm:$0xff]  }
  0x5c   :  { %988 = vmatpush1.bf16.msra.mxu1 %v2471_v53  ;;  %938 = vmatprep.subr.bf16.mxu0 %v2478_v49  ;;  %3106 = vst [vmem:[#allocation46_spill] sm:$0xff] %v2502_v59  ;;  %v2507_v53 = vld [vmem:[%s2988_s2 + $0x3ec] ss:$16 sps:$4 sm:$0xff]   ;;  %v2514_v49 = vld [vmem:[%s2988_s2 + $0x1e8] ss:$16 sps:$4 sm:$0xff]  }
  0x5d   :  { %989 = vmatprep.subr.bf16.mxu1 %v2483_v51  ;;  %3107 = vst [vmem:[#allocation47_spill] sm:$0xff] %v2507_v53  ;;  %3108 = vst [vmem:[#allocation48_spill] sm:$0xff] %v2514_v49  ;;  %v2519_v51 = vld [vmem:[%s2988_s2 + $0x3e8] ss:$16 sps:$4 sm:$0xff]  }
  0x5e   :  { %3109 = vst [vmem:[#allocation49_spill] sm:$0xff] %v2519_v51 }
  0x5f   :  { %939 = vmatpush1.bf16.msra.mxu0 %v2490_v54  ;;  %v2526_v54 = vld [vmem:[%s2988_s2 + $0x1cc] ss:$16 sps:$4 sm:$0xff]  }
  0x60   :  { %990 = vmatpush1.bf16.msra.mxu1 %v2495_v63  ;;  %940 = vmatprep.subr.bf16.mxu0 %v2502_v59  ;;  %3110 = vst [vmem:[#allocation50_spill] sm:$0xff] %v2526_v54  ;;  %v2531_v63 = vld [vmem:[%s2988_s2 + $0x3cc] ss:$16 sps:$4 sm:$0xff]   ;;  %v2538_v59 = vld [vmem:[%s2988_s2 + $0x1c8] ss:$16 sps:$4 sm:$0xff]  }
  0x61   :  { %991 = vmatprep.subr.bf16.mxu1 %v2507_v53  ;;  %3111 = vst [vmem:[#allocation51_spill] sm:$0xff] %v2531_v63  ;;  %3112 = vst [vmem:[#allocation52_spill] sm:$0xff] %v2538_v59  ;;  %v2543_v53 = vld [vmem:[%s2988_s2 + $0x3c8] ss:$16 sps:$4 sm:$0xff]  }
  0x62   :  { %3113 = vst [vmem:[#allocation53_spill] sm:$0xff] %v2543_v53 }
  0x63   :  { %941 = vmatpush2.bf16.msra.mxu0 %v2514_v49  ;;  %v2550_v49 = vld [vmem:[%s2988_s2 + $0x1ac] ss:$16 sps:$4 sm:$0xff]  }
  0x64   :  { %992 = vmatpush2.bf16.msra.mxu1 %v2519_v51  ;;  %942 = vmatprep.subr.bf16.mxu0 %v2526_v54  ;;  %3114 = vst [vmem:[#allocation54_spill] sm:$0xff] %v2550_v49  ;;  %v2555_v51 = vld [vmem:[%s2988_s2 + $0x3ac] ss:$16 sps:$4 sm:$0xff]   ;;  %v2562_v54 = vld [vmem:[%s2988_s2 + $0x1a8] ss:$16 sps:$4 sm:$0xff]  }
  0x65   :  { %993 = vmatprep.subr.bf16.mxu1 %v2531_v63  ;;  %3115 = vst [vmem:[#allocation55_spill] sm:$0xff] %v2555_v51  ;;  %3116 = vst [vmem:[#allocation56_spill] sm:$0xff] %v2562_v54  ;;  %v2567_v63 = vld [vmem:[%s2988_s2 + $0x3a8] ss:$16 sps:$4 sm:$0xff]  }
  0x66   :  { %3117 = vst [vmem:[#allocation57_spill] sm:$0xff] %v2567_v63 }
  0x67   :  { %943 = vmatpush2.bf16.msra.mxu0 %v2538_v59  ;;  %v2574_v59 = vld [vmem:[%s2988_s2 + $0x18c] ss:$16 sps:$4 sm:$0xff]  }
  0x68   :  { %994 = vmatpush2.bf16.msra.mxu1 %v2543_v53  ;;  %944 = vmatprep.subr.bf16.mxu0 %v2550_v49  ;;  %3118 = vst [vmem:[#allocation58_spill] sm:$0xff] %v2574_v59  ;;  %v2579_v53 = vld [vmem:[%s2988_s2 + $0x38c] ss:$16 sps:$4 sm:$0xff]   ;;  %v2586_v49 = vld [vmem:[%s2988_s2 + $0x188] ss:$16 sps:$4 sm:$0xff]  }
  0x69   :  { %995 = vmatprep.subr.bf16.mxu1 %v2555_v51  ;;  %3119 = vst [vmem:[#allocation59_spill] sm:$0xff] %v2579_v53  ;;  %3120 = vst [vmem:[#allocation60_spill] sm:$0xff] %v2586_v49  ;;  %v2591_v51 = vld [vmem:[%s2988_s2 + $0x388] ss:$16 sps:$4 sm:$0xff]  }
  0x6a   :  { %3121 = vst [vmem:[#allocation61_spill] sm:$0xff] %v2591_v51 }
  0x6b   :  { %945 = vmatpush2.bf16.msra.mxu0 %v2562_v54  ;;  %v2598_v54 = vld [vmem:[%s2988_s2 + $0x16c] ss:$16 sps:$4 sm:$0xff]  }
  0x6c   :  { %996 = vmatpush2.bf16.msra.mxu1 %v2567_v63  ;;  %946 = vmatprep.subr.bf16.mxu0 %v2574_v59  ;;  %3122 = vst [vmem:[#allocation62_spill] sm:$0xff] %v2598_v54  ;;  %v2603_v63 = vld [vmem:[%s2988_s2 + $0x36c] ss:$16 sps:$4 sm:$0xff]   ;;  %v2610_v59 = vld [vmem:[%s2988_s2 + $0x168] ss:$16 sps:$4 sm:$0xff]  }
  0x6d   :  { %997 = vmatprep.subr.bf16.mxu1 %v2579_v53  ;;  %3123 = vst [vmem:[#allocation63_spill] sm:$0xff] %v2603_v63  ;;  %3124 = vst [vmem:[#allocation64_spill] sm:$0xff] %v2610_v59  ;;  %v2615_v53 = vld [vmem:[%s2988_s2 + $0x368] ss:$16 sps:$4 sm:$0xff]  }
  0x6e   :  { %3125 = vst [vmem:[#allocation65_spill] sm:$0xff] %v2615_v53 }
  0x6f   :  { %947 = vmatpush2.bf16.msra.mxu0 %v2586_v49  ;;  %v2622_v49 = vld [vmem:[%s2988_s2 + $0x14c] ss:$16 sps:$4 sm:$0xff]  }
  0x70   :  { %998 = vmatpush2.bf16.msra.mxu1 %v2591_v51  ;;  %948 = vmatprep.subr.bf16.mxu0 %v2598_v54  ;;  %3126 = vst [vmem:[#allocation66_spill] sm:$0xff] %v2622_v49  ;;  %v2627_v51 = vld [vmem:[%s2988_s2 + $0x34c] ss:$16 sps:$4 sm:$0xff]   ;;  %v2634_v54 = vld [vmem:[%s2988_s2 + $0x148] ss:$16 sps:$4 sm:$0xff]  }
  0x71   :  { %999 = vmatprep.subr.bf16.mxu1 %v2603_v63  ;;  %3127 = vst [vmem:[#allocation67_spill] sm:$0xff] %v2627_v51  ;;  %3128 = vst [vmem:[#allocation68_spill] sm:$0xff] %v2634_v54  ;;  %v2639_v63 = vld [vmem:[%s2988_s2 + $0x348] ss:$16 sps:$4 sm:$0xff]  }
  0x72   :  { %3129 = vst [vmem:[#allocation69_spill] sm:$0xff] %v2639_v63 }
  0x73   :  { %949 = vmatpush2.bf16.msra.mxu0 %v2610_v59  ;;  %v2646_v59 = vld [vmem:[%s2988_s2 + $0x12c] ss:$16 sps:$4 sm:$0xff]  }
  0x74   :  { %1000 = vmatpush2.bf16.msra.mxu1 %v2615_v53  ;;  %950 = vmatprep.subr.bf16.mxu0 %v2622_v49  ;;  %3130 = vst [vmem:[#allocation70_spill] sm:$0xff] %v2646_v59  ;;  %v2651_v53 = vld [vmem:[%s2988_s2 + $0x32c] ss:$16 sps:$4 sm:$0xff]   ;;  %v2658_v49 = vld [vmem:[%s2988_s2 + $0x128] ss:$16 sps:$4 sm:$0xff]  }
  0x75   :  { %1001 = vmatprep.subr.bf16.mxu1 %v2627_v51  ;;  %3131 = vst [vmem:[#allocation71_spill] sm:$0xff] %v2651_v53  ;;  %v2663_v51 = vld [vmem:[%s2988_s2 + $0x328] ss:$16 sps:$4 sm:$0xff]  }
  0x77   :  { %951 = vmatpush2.bf16.msra.mxu0 %v2634_v54  ;;  %v2670_v54 = vld [vmem:[%s2988_s2 + $0x10c] ss:$16 sps:$4 sm:$0xff]  }
  0x78   :  { %1002 = vmatpush2.bf16.msra.mxu1 %v2639_v63  ;;  %952 = vmatprep.subr.bf16.mxu0 %v2646_v59  ;;  %v2675_v63 = vld [vmem:[%s2988_s2 + $0x30c] ss:$16 sps:$4 sm:$0xff]   ;;  %v2682_v59 = vld [vmem:[%s2988_s2 + $0x108] ss:$16 sps:$4 sm:$0xff]  }
  0x79   :  { %1003 = vmatprep.subr.bf16.mxu1 %v2651_v53  ;;  %v2687_v53 = vld [vmem:[%s2988_s2 + $0x308] ss:$16 sps:$4 sm:$0xff]  }
  0x7b   :  { %953 = vmatpush2.bf16.msra.mxu0 %v2658_v49 }
  0x7c   :  { %1004 = vmatpush2.bf16.msra.mxu1 %v2663_v51  ;;  %954 = vmatprep.subr.bf16.mxu0 %v2670_v54 }
  0x7d   :  { %1005 = vmatprep.subr.bf16.mxu1 %v2675_v63 }
  0x7f   :  { %955 = vmatpush2.bf16.msra.mxu0 %v2682_v59 }
  0x80   :  { %1006 = vmatpush2.bf16.msra.mxu1 %v2687_v53  ;;  %1066 = vmatprep.subr.bf16.mxu0 %v1884_v0  ;;  %v2710_v0 = vld [vmem:[%s2990_s1 + $0x4] ss:$16 sps:$4 sm:$0xff]  }
  0x81   :  { %1117 = vmatprep.subr.bf16.mxu1 %v1889_v1  ;;  %v2715_v1 = vld [vmem:[%s2990_s1 + $0xc] ss:$16 sps:$4 sm:$0xff]  }
  0x82   :  { %957 = vmatmul.mubr.bf16.vlgmr.msra.gmra.mxu0 %v2288_v60  ;;  %v3175_v60 = vld [vmem:[#allocation45_spill] sm:$0xff] }
  0x83   :  { %1008 = vmatmul.mubr.bf16.vlgmr.msra.gmra.mxu1 %v2293_v61  ;;  %1067 = vmatpush1.bf16.msra.mxu0 %v1895_v2  ;;  %v3132_v2 = vld [vmem:[#allocation2_spill] sm:$0xff] }
  0x84   :  { %1118 = vmatpush1.bf16.msra.mxu1 %v1900_v3  ;;  %1068 = vmatprep.subr.bf16.mxu0 %v1906_v4  ;;  %v3133_v3 = vld [vmem:[#allocation3_spill] sm:$0xff]  ;;  %v3134_v4 = vld [vmem:[#allocation4_spill] sm:$0xff]  ;;  %v3176_v61 = vld [vmem:[#allocation46_spill] sm:$0xff] }
  0x85   :  { %1119 = vmatprep.subr.bf16.mxu1 %v1913_v5  ;;  %966 = vmatprep.mubr.bf16.mxu0 %v2423_v57  ;;  %v3135_v5 = vld [vmem:[#allocation5_spill] sm:$0xff]  ;;  %v3174_v57 = vld [vmem:[#allocation44_spill] sm:$0xff] }
  0x86   :  { %1017 = vmatprep.mubr.bf16.mxu1 %v2425_v52  ;;  %v3172_v52 = vld [vmem:[#allocation42_spill] sm:$0xff] }
  0x87   :  { %1069 = vmatpush1.bf16.msra.mxu0 %v1918_v6  ;;  %v3136_v6 = vld [vmem:[#allocation6_spill] sm:$0xff] }
  0x88   :  { %1120 = vmatpush1.bf16.msra.mxu1 %v1924_v7  ;;  %1070 = vmatprep.subr.bf16.mxu0 %v1930_v8  ;;  %v3137_v7 = vld [vmem:[#allocation7_spill] sm:$0xff]  ;;  %v3138_v8 = vld [vmem:[#allocation8_spill] sm:$0xff] }
  0x89   :  { %1121 = vmatprep.subr.bf16.mxu1 %v1935_v9  ;;  %v3139_v9 = vld [vmem:[#allocation9_spill] sm:$0xff] }
  0x8a   :  { %967 = vmatmul.mubr.bf16.gmra.mxu0 %v2427_v50  ;;  %v3171_v50 = vld [vmem:[#allocation41_spill] sm:$0xff] }
  0x8b   :  { %1018 = vmatmul.mubr.bf16.gmra.mxu1 %v2429_v48  ;;  %1071 = vmatpush1.bf16.msra.mxu0 %v1940_v10  ;;  %v3140_v10 = vld [vmem:[#allocation10_spill] sm:$0xff]  ;;  %v3170_v48 = vld [vmem:[#allocation40_spill] sm:$0xff] }
  0x8c   :  { %1122 = vmatpush1.bf16.msra.mxu1 %v1945_v11  ;;  %1072 = vmatprep.subr.bf16.mxu0 %v1952_v12  ;;  %v3141_v11 = vld [vmem:[#allocation11_spill] sm:$0xff]  ;;  %v3142_v12 = vld [vmem:[#allocation12_spill] sm:$0xff] }
  0x8d   :  { %1123 = vmatprep.subr.bf16.mxu1 %v1959_v13  ;;  %1098 = vmatprep.mubr.bf16.mxu0 %v2710_v0  ;;  %v3143_v13 = vld [vmem:[#allocation13_spill] sm:$0xff] }
  0x8e   :  { %1149 = vmatprep.mubr.bf16.mxu1 %v2715_v1 }
  0x8f   :  { %1073 = vmatpush1.bf16.msra.mxu0 %v1964_v14  ;;  %v3144_v14 = vld [vmem:[#allocation14_spill] sm:$0xff] }
  0x90   :  { %1124 = vmatpush1.bf16.msra.mxu1 %v1971_v15  ;;  %1074 = vmatprep.subr.bf16.mxu0 %v1976_v16  ;;  %v3145_v15 = vld [vmem:[#allocation15_spill] sm:$0xff]  ;;  %v2776_v16 = vld [vmem:[%s2990_s1] ss:$16 sps:$4 sm:$0xff]  }
  0x91   :  { %1125 = vmatprep.subr.bf16.mxu1 %v1983_v17  ;;  %v2781_v17 = vld [vmem:[%s2990_s1 + $0x8] ss:$16 sps:$4 sm:$0xff]  }
  0x93   :  { %1075 = vmatpush1.bf16.msra.mxu0 %v1988_v18  ;;  %v1030_v18 = vld [vmem:[%s2990_s1 + $0x20] sm:$0xff] }
  0x94   :  { %1126 = vmatpush1.bf16.msra.mxu1 %v1993_v19  ;;  %1076 = vmatprep.subr.bf16.mxu0 %v2000_v20  ;;  %v1031_v19 = vld [vmem:[%s2990_s1 + $0x28] sm:$0xff]  ;;  %v3146_v20 = vld [vmem:[#allocation16_spill] sm:$0xff] }
  0x95   :  { %1127 = vmatprep.subr.bf16.mxu1 %v2007_v21  ;;  %v3147_v21 = vld [vmem:[#allocation17_spill] sm:$0xff] }
  0x97   :  { %1077 = vmatpush1.bf16.msra.mxu0 %v2012_v22  ;;  %v3148_v22 = vld [vmem:[#allocation18_spill] sm:$0xff] }
  0x98   :  { %1128 = vmatpush1.bf16.msra.mxu1 %v2019_v23  ;;  %1078 = vmatprep.subr.bf16.mxu0 %v2024_v24  ;;  %v3149_v23 = vld [vmem:[#allocation19_spill] sm:$0xff]  ;;  %v2793_v24 = vcombine.high %v1030_v18, %v1030_v18 }
  0x99   :  { %1129 = vmatprep.subr.bf16.mxu1 %v2031_v25  ;;  %v2795_v25 = vcombine.high %v1031_v19, %v1031_v19 }
  0x9b   :  { %1079 = vmatpush1.bf16.msra.mxu0 %v2036_v26  ;;  %v3150_v26 = vld [vmem:[#allocation20_spill] sm:$0xff] }
  0x9c   :  { %1130 = vmatpush1.bf16.msra.mxu1 %v2041_v27  ;;  %1080 = vmatprep.subr.bf16.mxu0 %v2048_v28  ;;  %v3151_v27 = vld [vmem:[#allocation21_spill] sm:$0xff]  ;;  %v3152_v28 = vld [vmem:[#allocation22_spill] sm:$0xff] }
  0x9d   :  { %1131 = vmatprep.subr.bf16.mxu1 %v2055_v29  ;;  %v3153_v29 = vld [vmem:[#allocation23_spill] sm:$0xff] }
  0x9f   :  { %1081 = vmatpush1.bf16.msra.mxu0 %v2060_v30  ;;  %v2805_v30 = vcombine.low %v1030_v18, %v1030_v18  ;;  %v3196_v18 = vld [vmem:[#allocation66_spill] sm:$0xff] }
  0xa0   :  { %1132 = vmatpush1.bf16.msra.mxu1 %v2067_v31  ;;  %1082 = vmatprep.subr.bf16.mxu0 %v2072_v32  ;;  %v2807_v31 = vcombine.low %v1031_v19, %v1031_v19  ;;  %v3154_v32 = vld [vmem:[#allocation24_spill] sm:$0xff]  ;;  %v3197_v19 = vld [vmem:[#allocation67_spill] sm:$0xff] }
  0xa1   :  { %1133 = vmatprep.subr.bf16.mxu1 %v2079_v33  ;;  %v3155_v33 = vld [vmem:[#allocation25_spill] sm:$0xff] }
  0xa3   :  { %1083 = vmatpush2.bf16.msra.mxu0 %v2084_v34  ;;  %v3156_v34 = vld [vmem:[#allocation26_spill] sm:$0xff] }
  0xa4   :  { %1134 = vmatpush2.bf16.msra.mxu1 %v2089_v35  ;;  %1084 = vmatprep.subr.bf16.mxu0 %v2096_v36  ;;  %v3157_v35 = vld [vmem:[#allocation27_spill] sm:$0xff]  ;;  %v3158_v36 = vld [vmem:[#allocation28_spill] sm:$0xff] }
  0xa5   :  { %1135 = vmatprep.subr.bf16.mxu1 %v2103_v37  ;;  %v3159_v37 = vld [vmem:[#allocation29_spill] sm:$0xff] }
  0xa7   :  { %1085 = vmatpush2.bf16.msra.mxu0 %v2108_v38  ;;  %v3160_v38 = vld [vmem:[#allocation30_spill] sm:$0xff] }
  0xa8   :  { %1136 = vmatpush2.bf16.msra.mxu1 %v2115_v39  ;;  %1086 = vmatprep.subr.bf16.mxu0 %v2120_v40  ;;  %v3161_v39 = vld [vmem:[#allocation31_spill] sm:$0xff]  ;;  %v3162_v40 = vld [vmem:[#allocation32_spill] sm:$0xff] }
  0xa9   :  { %1137 = vmatprep.subr.bf16.mxu1 %v2127_v41  ;;  %v3163_v41 = vld [vmem:[#allocation33_spill] sm:$0xff] }
  0xab   :  { %1087 = vmatpush2.bf16.msra.mxu0 %v2132_v42  ;;  %v3164_v42 = vld [vmem:[#allocation34_spill] sm:$0xff] }
  0xac   :  { %1138 = vmatpush2.bf16.msra.mxu1 %v2137_v43  ;;  %1088 = vmatprep.subr.bf16.mxu0 %v2144_v44  ;;  %v3165_v43 = vld [vmem:[#allocation35_spill] sm:$0xff]  ;;  %v3166_v44 = vld [vmem:[#allocation36_spill] sm:$0xff] }
  0xad   :  { %1139 = vmatprep.subr.bf16.mxu1 %v2151_v45  ;;  %v3167_v45 = vld [vmem:[#allocation37_spill] sm:$0xff] }
  0xaf   :  { %1089 = vmatpush2.bf16.msra.mxu0 %v2156_v46  ;;  %v3168_v46 = vld [vmem:[#allocation38_spill] sm:$0xff] }
  0xb0   :  { %1140 = vmatpush2.bf16.msra.mxu1 %v2161_v47  ;;  %1090 = vmatprep.subr.bf16.mxu0 %v3132_v2  ;;  %v3169_v47 = vld [vmem:[#allocation39_spill] sm:$0xff]  ;;  %v3182_v2 = vld [vmem:[#allocation52_spill] sm:$0xff] }
  0xb1   :  { %1141 = vmatprep.subr.bf16.mxu1 %v3133_v3  ;;  %v3183_v3 = vld [vmem:[#allocation53_spill] sm:$0xff] }
  0xb3   :  { %1091 = vmatpush2.bf16.msra.mxu0 %v3134_v4  ;;  %v3184_v4 = vld [vmem:[#allocation54_spill] sm:$0xff] }
  0xb4   :  { %1142 = vmatpush2.bf16.msra.mxu1 %v3135_v5  ;;  %1092 = vmatprep.subr.bf16.mxu0 %v3136_v6  ;;  %v3185_v5 = vld [vmem:[#allocation55_spill] sm:$0xff]  ;;  %v3186_v6 = vld [vmem:[#allocation56_spill] sm:$0xff] }
  0xb5   :  { %1143 = vmatprep.subr.bf16.mxu1 %v3137_v7  ;;  %v3187_v7 = vld [vmem:[#allocation57_spill] sm:$0xff] }
  0xb7   :  { %1093 = vmatpush2.bf16.msra.mxu0 %v3138_v8  ;;  %v3188_v8 = vld [vmem:[#allocation58_spill] sm:$0xff] }
  0xb8   :  { %1144 = vmatpush2.bf16.msra.mxu1 %v3139_v9  ;;  %1094 = vmatprep.subr.bf16.mxu0 %v3140_v10  ;;  %v3189_v9 = vld [vmem:[#allocation59_spill] sm:$0xff]  ;;  %v3190_v10 = vld [vmem:[#allocation60_spill] sm:$0xff] }
  0xb9   :  { %1145 = vmatprep.subr.bf16.mxu1 %v3141_v11  ;;  %v3191_v11 = vld [vmem:[#allocation61_spill] sm:$0xff] }
  0xbb   :  { %1095 = vmatpush2.bf16.msra.mxu0 %v3142_v12  ;;  %v3192_v12 = vld [vmem:[#allocation62_spill] sm:$0xff] }
  0xbc   :  { %1146 = vmatpush2.bf16.msra.mxu1 %v3143_v13  ;;  %1096 = vmatprep.subr.bf16.mxu0 %v3144_v14  ;;  %v3193_v13 = vld [vmem:[#allocation63_spill] sm:$0xff]  ;;  %v3194_v14 = vld [vmem:[#allocation64_spill] sm:$0xff] }
  0xbd   :  { %1147 = vmatprep.subr.bf16.mxu1 %v3145_v15  ;;  %v3195_v15 = vld [vmem:[#allocation65_spill] sm:$0xff] }
  0xbf   :  { %1097 = vmatpush2.bf16.msra.mxu0 %v3146_v20  ;;  %v3198_v20 = vld [vmem:[#allocation68_spill] sm:$0xff] }
  0xc0   :  { %1148 = vmatpush2.bf16.msra.mxu1 %v3147_v21  ;;  %1168 = vmatprep.subr.bf16.mxu0 %v3148_v22  ;;  %v3199_v21 = vld [vmem:[#allocation69_spill] sm:$0xff]  ;;  %v3200_v22 = vld [vmem:[#allocation70_spill] sm:$0xff] }
  0xc1   :  { %1219 = vmatprep.subr.bf16.mxu1 %v3149_v23  ;;  %v3201_v23 = vld [vmem:[#allocation71_spill] sm:$0xff] }
  0xc2   :  { %1099 = vmatmul.mubr.bf16.vlgmr.msra.gmra.mxu0 %v2776_v16 }
  0xc3   :  { %1150 = vmatmul.mubr.bf16.vlgmr.msra.gmra.mxu1 %v2781_v17  ;;  %1169 = vmatpush1.bf16.msra.mxu0 %v3150_v26 }
  0xc4   :  { %1220 = vmatpush1.bf16.msra.mxu1 %v3151_v27  ;;  %1170 = vmatprep.subr.bf16.mxu0 %v3152_v28 }
  0xc5   :  { %1221 = vmatprep.subr.bf16.mxu1 %v3153_v29  ;;  %1108 = vmatprep.mubr.bf16.mxu0 %v2793_v24 }
  0xc6   :  { %1159 = vmatprep.mubr.bf16.mxu1 %v2795_v25 }
  0xc7   :  { %1171 = vmatpush1.bf16.msra.mxu0 %v3154_v32 }
  0xc8   :  { %1222 = vmatpush1.bf16.msra.mxu1 %v3155_v33  ;;  %1172 = vmatprep.subr.bf16.mxu0 %v3156_v34 }
  0xc9   :  { %1223 = vmatprep.subr.bf16.mxu1 %v3157_v35 }
  0xca   :  { %1109 = vmatmul.mubr.bf16.gmra.mxu0 %v2805_v30 }
  0xcb   :  { %1160 = vmatmul.mubr.bf16.gmra.mxu1 %v2807_v31  ;;  %1173 = vmatpush1.bf16.msra.mxu0 %v3158_v36 }
  0xcc   :  { %1224 = vmatpush1.bf16.msra.mxu1 %v3159_v37  ;;  %1174 = vmatprep.subr.bf16.mxu0 %v3160_v38 }
  0xcd   :  { %1225 = vmatprep.subr.bf16.mxu1 %v3161_v39  ;;  %1200 = vmatprep.mubr.bf16.mxu0 %v2710_v0  ;;  %v3180_v0 = vld [vmem:[#allocation50_spill] sm:$0xff] }
  0xce   :  { %1251 = vmatprep.mubr.bf16.mxu1 %v2715_v1  ;;  %v3181_v1 = vld [vmem:[#allocation51_spill] sm:$0xff] }
  0xcf   :  { %1175 = vmatpush1.bf16.msra.mxu0 %v3162_v40 }
  0xd0   :  { %1226 = vmatpush1.bf16.msra.mxu1 %v3163_v41  ;;  %1176 = vmatprep.subr.bf16.mxu0 %v2384_v56  ;;  %v3173_v56 = vld [vmem:[#allocation43_spill] sm:$0xff] }
  0xd1   :  { %1227 = vmatprep.subr.bf16.mxu1 %v3164_v42 }
  0xd3   :  { %1177 = vmatpush1.bf16.msra.mxu0 %v2396_v62  ;;  %v3178_v62 = vld [vmem:[#allocation48_spill] sm:$0xff] }
  0xd4   :  { %1228 = vmatpush1.bf16.msra.mxu1 %v3165_v43  ;;  %1178 = vmatprep.subr.bf16.mxu0 %v3166_v44 }
  0xd5   :  { %1229 = vmatprep.subr.bf16.mxu1 %v3167_v45 }
  0xd7   :  { %1179 = vmatpush1.bf16.msra.mxu0 %v2438_v58  ;;  %v3177_v58 = vld [vmem:[#allocation47_spill] sm:$0xff] }
  0xd8   :  { %1230 = vmatpush1.bf16.msra.mxu1 %v2443_v55  ;;  %1180 = vmatprep.subr.bf16.mxu0 %v3168_v46  ;;  %v3179_v55 = vld [vmem:[#allocation49_spill] sm:$0xff] }
  0xd9   :  { %1231 = vmatprep.subr.bf16.mxu1 %v3169_v47 }
  0xdb   :  { %1181 = vmatpush1.bf16.msra.mxu0 %v3170_v48 }
  0xdc   :  { %1232 = vmatpush1.bf16.msra.mxu1 %v3171_v50  ;;  %1182 = vmatprep.subr.bf16.mxu0 %v3172_v52 }
  0xdd   :  { %1233 = vmatprep.subr.bf16.mxu1 %v3173_v56 }
  0xdf   :  { %1183 = vmatpush1.bf16.msra.mxu0 %v3174_v57 }
  0xe0   :  { %1234 = vmatpush1.bf16.msra.mxu1 %v3175_v60  ;;  %1184 = vmatprep.subr.bf16.mxu0 %v3176_v61 }
  0xe1   :  { %1235 = vmatprep.subr.bf16.mxu1 %v3177_v58 }
  0xe3   :  { %1185 = vmatpush2.bf16.msra.mxu0 %v3178_v62 }
  0xe4   :  { %1236 = vmatpush2.bf16.msra.mxu1 %v3179_v55  ;;  %1186 = vmatprep.subr.bf16.mxu0 %v3180_v0 }
  0xe5   :  { %1237 = vmatprep.subr.bf16.mxu1 %v3181_v1 }
  0xe7   :  { %1187 = vmatpush2.bf16.msra.mxu0 %v3182_v2 }
  0xe8   :  { %1238 = vmatpush2.bf16.msra.mxu1 %v3183_v3  ;;  %1188 = vmatprep.subr.bf16.mxu0 %v3184_v4 }
  0xe9   :  { %1239 = vmatprep.subr.bf16.mxu1 %v3185_v5 }
  0xeb   :  { %1189 = vmatpush2.bf16.msra.mxu0 %v3186_v6 }
  0xec   :  { %1240 = vmatpush2.bf16.msra.mxu1 %v3187_v7  ;;  %1190 = vmatprep.subr.bf16.mxu0 %v3188_v8 }
  0xed   :  { %1241 = vmatprep.subr.bf16.mxu1 %v3189_v9 }
  0xef   :  { %1191 = vmatpush2.bf16.msra.mxu0 %v3190_v10 }
  0xf0   :  { %1242 = vmatpush2.bf16.msra.mxu1 %v3191_v11  ;;  %1192 = vmatprep.subr.bf16.mxu0 %v3192_v12 }
  0xf1   :  { %1243 = vmatprep.subr.bf16.mxu1 %v3193_v13 }
  0xf3   :  { %1193 = vmatpush2.bf16.msra.mxu0 %v3194_v14 }
  0xf4   :  { %1244 = vmatpush2.bf16.msra.mxu1 %v3195_v15  ;;  %1194 = vmatprep.subr.bf16.mxu0 %v3196_v18 }
  0xf5   :  { %1245 = vmatprep.subr.bf16.mxu1 %v3197_v19 }
  0xf7   :  { %1195 = vmatpush2.bf16.msra.mxu0 %v3198_v20 }
  0xf8   :  { %1246 = vmatpush2.bf16.msra.mxu1 %v3199_v21  ;;  %1196 = vmatprep.subr.bf16.mxu0 %v3200_v22 }
  0xf9   :  { %1247 = vmatprep.subr.bf16.mxu1 %v3201_v23 }
  0xfb   :  { %1197 = vmatpush2.bf16.msra.mxu0 %v2658_v49 }
  0xfc   :  { %1248 = vmatpush2.bf16.msra.mxu1 %v2663_v51  ;;  %1198 = vmatprep.subr.bf16.mxu0 %v2670_v54 }
  0xfd   :  { %1249 = vmatprep.subr.bf16.mxu1 %v2675_v63 }
  0xff   :  { %1199 = vmatpush2.bf16.msra.mxu0 %v2682_v59 }
 0x100   :  { %1250 = vmatpush2.bf16.msra.mxu1 %v2687_v53 }
 0x102   :  { %v856_v26 = vpop.f32.mrf.mxu0  ;;  %1201 = vmatmul.mubr.bf16.vlgmr.msra.gmra.mxu0 %v2776_v16 }
 0x103   :  { %v907_v27 = vpop.f32.mrf.mxu1  ;;  %1252 = vmatmul.mubr.bf16.vlgmr.msra.gmra.mxu1 %v2781_v17  ;;  %1210 = vmatprep.mubr.bf16.mxu0 %v2793_v24 }
 0x104   :  { %v908_v28 = vadd.f32 %v907_v27, %v856_v26  ;;  %1261 = vmatprep.mubr.bf16.mxu1 %v2795_v25  ;;  %v858_v49 = vpop.f32.mrf.mxu0 }
 0x105   :  { %v909_v51 = vpop.f32.mrf.mxu1 }
 0x106   :  { %v910_v54 = vadd.f32 %v909_v51, %v858_v49  ;;  %v860_v29 = vpop.f32.mrf.mxu0  ;;  %v1270_v45 = vmul.f32 %v908_v28, %v908_v28 }
 0x107   :  { %v911_v63 = vpop.f32.mrf.mxu1 }
 0x108   :  { %v912_v32 = vadd.f32 %v911_v63, %v860_v29  ;;  %v862_v59 = vpop.f32.mrf.mxu0  ;;  %v1271_v48 = vmul.f32 %v910_v54, %v910_v54 }
 0x109   :  { %v913_v33 = vpop.f32.mrf.mxu1 }
 0x10a   :  { %v914_v53 = vadd.f32 %v913_v33, %v862_v59  ;;  %1211 = vmatmul.mubr.bf16.gmra.mxu0 %v2805_v30  ;;  %v1272_v61 = vmul.f32 %v912_v32, %v912_v32 }
 0x10b   :  { %1262 = vmatmul.mubr.bf16.gmra.mxu1 %v2807_v31 }
 0x10c   :  { %v1273_v2 = vmul.f32 %v914_v53, %v914_v53 }
 0x112   :  { %v866_v16 = vpop.f32.mrf.mxu0 }
 0x113   :  { %v917_v17 = vpop.f32.mrf.mxu1 }
 0x114   :  { %v918_v34 = vadd.f32 %v917_v17, %v866_v16  ;;  %v868_v35 = vpop.f32.mrf.mxu0 }
 0x115   :  { %v919_v24 = vpop.f32.mrf.mxu1 }
 0x116   :  { %v920_v36 = vadd.f32 %v919_v24, %v868_v35  ;;  %v870_v25 = vpop.f32.mrf.mxu0  ;;  %v1274_v10 = vmul.f32 %v918_v34, %v918_v34 }
 0x117   :  { %v921_v37 = vpop.f32.mrf.mxu1 }
 0x118   :  { %v871_v38 = vpop.f32.mrf.mxu0  ;;  %v1275_v14 = vmul.f32 %v920_v36, %v920_v36 }
 0x119   :  { %v922_v39 = vpop.f32.mrf.mxu1 }
 0x142   :  { %v958_v40 = vpop.f32.mrf.mxu0 }
 0x143   :  { %v1009_v41 = vpop.f32.mrf.mxu1 }
 0x144   :  { %v1010_v42 = vadd.f32 %v1009_v41, %v958_v40  ;;  %v960_v43 = vpop.f32.mrf.mxu0 }
 0x145   :  { %v1011_v44 = vpop.f32.mrf.mxu1 }
 0x146   :  { %v1276_v46 = vmul.f32 %v1010_v42, %v1010_v42  ;;  %v1012_v30 = vadd.f32 %v1011_v44, %v960_v43  ;;  %v962_v47 = vpop.f32.mrf.mxu0 }
 0x147   :  { %v1013_v31 = vpop.f32.mrf.mxu1 }
 0x148   :  { %v1282_v50 = vadd.f32 %v1276_v46, %v1270_v45  ;;  %v1277_v52 = vmul.f32 %v1012_v30, %v1012_v30  ;;  %v1014_v56 = vadd.f32 %v1013_v31, %v962_v47  ;;  %v964_v57 = vpop.f32.mrf.mxu0 }
 0x149   :  { %v1015_v60 = vpop.f32.mrf.mxu1 }
 0x14a   :  { %v1283_v58 = vadd.f32 %v1277_v52, %v1271_v48  ;;  %v1278_v62 = vmul.f32 %v1014_v56, %v1014_v56  ;;  %v1016_v55 = vadd.f32 %v1015_v60, %v964_v57  ;;  %v968_v0 = vpop.f32.mrf.mxu0  ;;  %v1288_v38 = vmax.f32 %v1282_v50, 1e-07 }
 0x14b   :  { %v1019_v1 = vpop.f32.mrf.mxu1 }
 0x14c   :  { %v1284_v3 = vadd.f32 %v1278_v62, %v1272_v61  ;;  %v1279_v4 = vmul.f32 %v1016_v55, %v1016_v55  ;;  %v1020_v5 = vadd.f32 %v1019_v1, %v968_v0  ;;  %v970_v6 = vpop.f32.mrf.mxu0  ;;  %v1289_v39 = vmax.f32 %v1283_v58, 1e-07 }
 0x14d   :  { %v1021_v7 = vpop.f32.mrf.mxu1  ;;  %1825 = vlog2.f32 %v1288_v38 }
 0x14e   :  { %v1285_v8 = vadd.f32 %v1279_v4, %v1273_v2  ;;  %v1022_v9 = vadd.f32 %v1021_v7, %v970_v6  ;;  %v1280_v11 = vmul.f32 %v1020_v5, %v1020_v5  ;;  %v972_v12 = vpop.f32.mrf.mxu0  ;;  %v1290_v40 = vmax.f32 %v1284_v3, 1e-07 }
 0x14f   :  { %v1023_v13 = vpop.f32.mrf.mxu1  ;;  %1827 = vlog2.f32 %v1289_v39 }
 0x150   :  { %v1281_v15 = vmul.f32 %v1022_v9, %v1022_v9  ;;  %v1286_v18 = vadd.f32 %v1280_v11, %v1274_v10  ;;  %v973_v19 = vpop.f32.mrf.mxu0  ;;  %v2881_v44 = vmax.f32 %v1285_v8, 1e-07  ;;  %1829 = vlog2.f32 %v1290_v40 }
 0x151   :  { %v1024_v20 = vpop.f32.mrf.mxu1 }
 0x152   :  { %v2877_v21 = vadd.f32 %v1281_v15, %v1275_v14  ;;  %v2883_v48 = vmax.f32 %v1286_v18, 1e-07  ;;  %1831 = vlog2.f32 %v2881_v44 }
 0x154   :  { %1833 = vlog2.f32 %v2883_v48 }
 0x182   :  { %v1100_v22 = vpop.f32.mrf.mxu0 }
 0x183   :  { %v1151_v23 = vpop.f32.mrf.mxu1 }
 0x184   :  { %v1152_v26 = vadd.f32 %v1151_v23, %v1100_v22  ;;  %v1102_v27 = vpop.f32.mrf.mxu0 }
 0x185   :  { %v1153_v28 = vpop.f32.mrf.mxu1 }
 0x186   :  { %v1154_v49 = vadd.f32 %v1153_v28, %v1102_v27  ;;  %v1104_v51 = vpop.f32.mrf.mxu0  ;;  %v1294_v30 = vmul.f32 %v1152_v26, %v1152_v26 }
 0x187   :  { %v1155_v54 = vpop.f32.mrf.mxu1 }
 0x188   :  { %v1156_v29 = vadd.f32 %v1155_v54, %v1104_v51  ;;  %v1106_v63 = vpop.f32.mrf.mxu0  ;;  %v1295_v50 = vmul.f32 %v1154_v49, %v1154_v49 }
 0x189   :  { %v1157_v32 = vpop.f32.mrf.mxu1 }
 0x18a   :  { %v1158_v59 = vadd.f32 %v1157_v32, %v1106_v63  ;;  %v1110_v33 = vpop.f32.mrf.mxu0  ;;  %v1296_v3 = vmul.f32 %v1156_v29, %v1156_v29  ;;  %v1826_v29 = vpop.eup %1825 }
 0x18b   :  { %v1161_v53 = vpop.f32.mrf.mxu1 }
 0x18c   :  { %v1162_v16 = vadd.f32 %v1161_v53, %v1110_v33  ;;  %v1112_v17 = vpop.f32.mrf.mxu0  ;;  %v1297_v14 = vmul.f32 %v1158_v59, %v1158_v59  ;;  %v1828_v33 = vpop.eup %1827 }
 0x18d   :  { %v1163_v34 = vpop.f32.mrf.mxu1 }
 0x18e   :  { %v2879_v35 = vadd.f32 %v1163_v34, %v1112_v17  ;;  %v1114_v24 = vpop.f32.mrf.mxu0  ;;  %v1298_v49 = vmul.f32 %v1162_v16, %v1162_v16  ;;  %v1830_v34 = vpop.eup %1829 }
 0x18f   :  { %v1165_v36 = vpop.f32.mrf.mxu1  ;;  %v1293_v24 = vmax.f32 %v2877_v21, 1e-07 }
 0x190   :  { %v1115_v25 = vpop.f32.mrf.mxu0  ;;  %v1299_v16 = vmul.f32 %v2879_v35, %v2879_v35 }
 0x191   :  { %v1166_v37 = vpop.f32.mrf.mxu1 }
 0x1c2   :  { %v1202_v41 = vpop.f32.mrf.mxu0 }
 0x1c3   :  { %v1253_v42 = vpop.f32.mrf.mxu1 }
 0x1c4   :  { %v1254_v43 = vadd.f32 %v1253_v42, %v1202_v41  ;;  %v1204_v45 = vpop.f32.mrf.mxu0 }
 0x1c5   :  { %v1255_v46 = vpop.f32.mrf.mxu1 }
 0x1c6   :  { %v1300_v47 = vmul.f32 %v1254_v43, %v1254_v43  ;;  %v1256_v31 = vadd.f32 %v1255_v46, %v1204_v45  ;;  %v1206_v52 = vpop.f32.mrf.mxu0  ;;  %v1403_v45 = vmul.f32 0.6931472, %v1826_v29 }
 0x1c7   :  { %v1257_v56 = vpop.f32.mrf.mxu1 }
 0x1c8   :  { %v1306_v57 = vadd.f32 %v1300_v47, %v1294_v30  ;;  %v1301_v60 = vmul.f32 %v1256_v31, %v1256_v31  ;;  %v1258_v61 = vadd.f32 %v1257_v56, %v1206_v52  ;;  %v1208_v58 = vpop.f32.mrf.mxu0  ;;  %v2918_v30 = vmul.f32 0.6931472, %v1830_v34 }
 0x1c9   :  { %v1259_v62 = vpop.f32.mrf.mxu1 }
 0x1ca   :  { %v1312_v55 = vmax.f32 %v1306_v57, 1e-07  ;;  %v1307_v0 = vadd.f32 %v1301_v60, %v1295_v50  ;;  %v1302_v1 = vmul.f32 %v1258_v61, %v1258_v61  ;;  %v1260_v2 = vadd.f32 %v1259_v62, %v1208_v58  ;;  %v1212_v4 = vpop.f32.mrf.mxu0 }
 0x1cb   :  { %v1263_v5 = vpop.f32.mrf.mxu1 }
 0x1cc   :  { %v2887_v6 = vadd.f32 %v1312_v55, %v1288_v38  ;;  %v2889_v7 = vmul.f32 %v1312_v55, %v1288_v38  ;;  %1835 = vlog2.f32 %v1312_v55  ;;  %v1313_v8 = vmax.f32 %v1307_v0, 1e-07  ;;  %v1214_v12 = vpop.f32.mrf.mxu0  ;;  %v1832_v38 = vpop.eup %1831 }
 0x1cd   :  { %v1308_v9 = vadd.f32 %v1302_v1, %v1296_v3  ;;  %v1303_v10 = vmul.f32 %v1260_v2, %v1260_v2  ;;  %v1264_v11 = vadd.f32 %v1263_v5, %v1212_v4  ;;  %v1265_v13 = vpop.f32.mrf.mxu1  ;;  %v1834_v41 = vpop.eup %1833  ;;  %v2920_v47 = vmul.f32 0.6931472, %v1832_v38 }
 0x1ce   :  { %1837 = vrsqrt.f32 %v2889_v7  ;;  %v2892_v15 = vadd.f32 %v1313_v8, %v1289_v39  ;;  %v2894_v18 = vmul.f32 %v1313_v8, %v1289_v39  ;;  %v1437_v19 = vadd.f32 %v1313_v8, %v1312_v55  ;;  %v1216_v20 = vpop.f32.mrf.mxu0 }
 0x1cf   :  { %1839 = vlog2.f32 %v1313_v8  ;;  %v1267_v22 = vpop.f32.mrf.mxu1  ;;  %v1314_v23 = vmax.f32 %v1308_v9, 1e-07  ;;  %v1309_v26 = vadd.f32 %v1303_v10, %v1297_v14  ;;  %v1304_v27 = vmul.f32 %v1264_v11, %v1264_v11 }
 0x1d0   :  { %v1266_v28 = vadd.f32 %v1265_v13, %v1214_v12  ;;  %1841 = vrsqrt.f32 %v2894_v18  ;;  %v1217_v51 = vpop.f32.mrf.mxu0  ;;  %v2923_v56 = vmul.f32 0.6931472, %v1834_v41  ;;  %vm1332_vm0 = vcmp.eq.f32.partialorder %v2889_v7, inf }
 0x1d1   :  { %v1268_v54 = vpop.f32.mrf.mxu1  ;;  %v2897_v63 = vadd.f32 %v1314_v23, %v1290_v40  ;;  %v2899_v32 = vmul.f32 %v1314_v23, %v1290_v40  ;;  %1843 = vlog2.f32 %v1314_v23  ;;  %v1315_v59 = vmax.f32 %v1309_v26, 1e-07 }
 0x1d2   :  { %v1310_v53 = vadd.f32 %v1304_v27, %v1298_v49  ;;  %v1305_v17 = vmul.f32 %v1266_v28, %v1266_v28  ;;  %vm1334_vm1 = vcmp.eq.f32.partialorder %v2889_v7, 0.0  ;;  %v1335_v62 = vand.u32 2147483648, %v2889_v7 }
 0x1d3   :  { %1845 = vrsqrt.f32 %v2899_v32  ;;  %v2906_v36 = vadd.f32 %v1315_v59, %v2881_v44  ;;  %v2909_v25 = vmul.f32 %v1315_v59, %v2881_v44  ;;  %v1438_v37 = vadd.f32 %v1315_v59, %v1314_v23 }
 0x1d4   :  { %1847 = vlog2.f32 %v1315_v59  ;;  %v1316_v39 = vmax.f32 %v1310_v53, 1e-07  ;;  %v1311_v40 = vadd.f32 %v1305_v17, %v1299_v16  ;;  %v1405_v44 = vmul.f32 0.6931472, %v1828_v33 }
 0x1d5   :  { %1849 = vrsqrt.f32 %v2909_v25  ;;  %v1440_v21 = vadd.f32 %v1438_v37, %v1437_v19  ;;  %vm1339_vm2 = vcmp.eq.f32.partialorder %v2894_v18, inf  ;;  %vm1341_vm3 = vcmp.eq.f32.partialorder %v2894_v18, 0.0 }
 0x1d6   :  { %v2913_v42 = vadd.f32 %v1316_v39, %v2883_v48  ;;  %v2916_v35 = vmul.f32 %v1316_v39, %v2883_v48  ;;  %1851 = vlog2.f32 %v1316_v39  ;;  %v1317_v46 = vmax.f32 %v1311_v40, 1e-07 }
 0x1d7   :  { %1853 = vlog2.f32 %v1293_v24  ;;  %v1342_v8 = vand.u32 2147483648, %v2894_v18  ;;  %vm1346_vm4 = vcmp.eq.f32.partialorder %v2899_v32, inf  ;;  %vm1348_vm5 = vcmp.eq.f32.partialorder %v2899_v32, 0.0 }
 0x1d8   :  { %1855 = vrsqrt.f32 %v2916_v35  ;;  %v2925_v50 = vadd.f32 %v1317_v46, %v1293_v24  ;;  %v2927_v48 = vmul.f32 %v1317_v46, %v1293_v24  ;;  %v1439_v58 = vadd.f32 %v1317_v46, %v1316_v39 }
 0x1d9   :  { %v1836_v43 = vpop.eup %1835  ;;  %1857 = vlog2.f32 %v1317_v46  ;;  %v1349_v19 = vand.u32 2147483648, %v2899_v32  ;;  %vm1353_vm6 = vcmp.eq.f32.partialorder %v2909_v25, inf  ;;  %vm1355_vm7 = vcmp.eq.f32.partialorder %v2909_v25, 0.0 }
 0x1da   :  { %v1391_v31 = vmul.f32 0.6931472, %v1836_v43  ;;  %1859 = vrsqrt.f32 %v2927_v48  ;;  %v2937_v2 = vadd.f32 %v1440_v21, %v1439_v58  ;;  %vm1360_vm8 = vcmp.eq.f32.partialorder %v2916_v35, inf }
 0x1db   :  { %v1838_v52 = vpop.eup %1837  ;;  %v1363_v37 = vand.u32 2147483648, %v2916_v35  ;;  %vm1362_vm9 = vcmp.eq.f32.partialorder %v2916_v35, 0.0  ;;  %vm1367_vm10 = vcmp.eq.f32.partialorder %v2927_v48, inf  ;;  %vm1369_vm11 = vcmp.eq.f32.partialorder %v2927_v48, 0.0 }
 0x1dc   :  { %v1840_v57 = vpop.eup %1839  ;;  %v1331_v60 = vmul.f32 %v1838_v52, %v2889_v7  ;;  %v1414_v61 = vsub.f32 %v1391_v31, %v1403_v45 }
 0x1dd   :  { %v1393_v55 = vmul.f32 0.6931472, %v1840_v57  ;;  %v1842_v0 = vpop.eup %1841 }
 0x1de   :  { %v1333_v1 = vsel %vm1332_vm0, %v2889_v7, %v1331_v60  ;;  %v1844_v3 = vpop.eup %1843  ;;  %v1338_v5 = vmul.f32 %v1842_v0, %v2894_v18  ;;  %v1420_v12 = vand.u32 2147483647, %v1414_v61 }
 0x1df   :  { %v1336_v4 = vsel %vm1334_vm1, %v1335_v62, %v1333_v1  ;;  %v1415_v9 = vsub.f32 %v1393_v55, %v1405_v44  ;;  %v1395_v11 = vmul.f32 0.6931472, %v1844_v3 }
 0x1e0   :  { %v1372_v10 = vmul.f32 2.0, %v1336_v4  ;;  %v1846_v7 = vpop.eup %1845  ;;  %v1340_v13 = vsel %vm1339_vm2, %v2894_v18, %v1338_v5 }
 0x1e1   :  { %v1421_v14 = vand.u32 2147483647, %v1415_v9  ;;  %v1848_v20 = vpop.eup %1847  ;;  %v1343_v23 = vsel %vm1341_vm3, %v1342_v8, %v1340_v13  ;;  %v1345_v26 = vmul.f32 %v1846_v7, %v2899_v32  ;;  %v1416_v27 = vsub.f32 %v1395_v11, %v2918_v30 }
 0x1e2   :  { %v1378_v22 = vsub.f32 %v2887_v6, %v1372_v10  ;;  %v1373_v28 = vmul.f32 2.0, %v1343_v23  ;;  %v1397_v51 = vmul.f32 0.6931472, %v1848_v20  ;;  %v1850_v54 = vpop.eup %1849  ;;  %v1356_v6 = vand.u32 2147483648, %v2909_v25 }
 0x1e3   :  { %v1448_v49 = vadd.f32 %v1421_v14, %v1420_v12  ;;  %v1347_v29 = vsel %vm1346_vm4, %v2899_v32, %v1345_v26  ;;  %v1852_v18 = vpop.eup %1851  ;;  %v1352_v53 = vmul.f32 %v1850_v54, %v2909_v25  ;;  %v1422_v41 = vand.u32 2147483647, %v1416_v27 }
 0x1e4   :  { %v1379_v59 = vsub.f32 %v2892_v15, %v1373_v28  ;;  %v1350_v33 = vsel %vm1348_vm5, %v1349_v19, %v1347_v29  ;;  %v1417_v17 = vsub.f32 %v1397_v51, %v2920_v47  ;;  %v1854_v34 = vpop.eup %1853  ;;  %v1384_v24 = vmax.f32 %v1378_v22, 0.0 }
 0x1e5   :  { %v1374_v16 = vmul.f32 2.0, %v1350_v33  ;;  %v1399_v38 = vmul.f32 0.6931472, %v1852_v18  ;;  %v1856_v39 = vpop.eup %1855  ;;  %v1354_v15 = vsel %vm1353_vm6, %v2909_v25, %v1352_v53  ;;  %v1413_v60 = vmul.f32 0.6931472, %v1854_v34 }
 0x1e6   :  { %v1385_v40 = vmax.f32 %v1379_v59, 0.0  ;;  %v1423_v21 = vand.u32 2147483647, %v1417_v17  ;;  %v1858_v32 = vpop.eup %1857  ;;  %v1357_v45 = vsel %vm1355_vm7, %v1356_v6, %v1354_v15  ;;  %v1359_v44 = vmul.f32 %v1856_v39, %v2916_v35 }
 0x1e7   :  { %v1380_v43 = vsub.f32 %v2897_v63, %v1374_v16  ;;  %v1418_v46 = vsub.f32 %v1399_v38, %v2923_v56  ;;  %v1375_v47 = vmul.f32 2.0, %v1357_v45  ;;  %v1401_v52 = vmul.f32 0.6931472, %v1858_v32  ;;  %v1860_v57 = vpop.eup %1859 }
 0x1e8   :  { %v1426_v30 = vadd.f32 %v1385_v40, %v1384_v24  ;;  %v1449_v31 = vadd.f32 %v1423_v21, %v1422_v41  ;;  %v1361_v61 = vsel %vm1360_vm8, %v2916_v35, %v1359_v44  ;;  %v1366_v62 = vmul.f32 %v1860_v57, %v2927_v48 }
 0x1e9   :  { %v1381_v63 = vsub.f32 %v2906_v36, %v1375_v47  ;;  %v1364_v58 = vsel %vm1362_vm9, %v1363_v37, %v1361_v61  ;;  %v1370_v56 = vand.u32 2147483648, %v2927_v48  ;;  %v1419_v0 = vsub.f32 %v1401_v52, %v1413_v60 }
 0x1ea   :  { %v1451_v25 = vadd.f32 %v1449_v31, %v1448_v49  ;;  %v1376_v55 = vmul.f32 2.0, %v1364_v58  ;;  %v1386_v1 = vmax.f32 %v1380_v43, 0.0  ;;  %v1368_v4 = vsel %vm1367_vm10, %v2927_v48, %v1366_v62 }
 0x1eb   :  { %v1387_v3 = vmax.f32 %v1381_v63, 0.0  ;;  %v1424_v5 = vand.u32 2147483647, %v1418_v46  ;;  %v1371_v36 = vsel %vm1369_vm11, %v1370_v56, %v1368_v4  ;;  %v1425_v8 = vand.u32 2147483647, %v1419_v0 }
 0x1ec   :  { %v1382_v35 = vsub.f32 %v2913_v42, %v1376_v55  ;;  %v1377_v10 = vmul.f32 2.0, %v1371_v36  ;;  %v1442_v11 = vrot.slane %v2937_v2, 4 }
 0x1ed   :  { %v1427_v9 = vadd.f32 %v1387_v3, %v1386_v1  ;;  %v1450_v7 = vadd.f32 %v1425_v8, %v1424_v5 }
 0x1ee   :  { %v1383_v13 = vsub.f32 %v2925_v50, %v1377_v10  ;;  %v1388_v19 = vmax.f32 %v1382_v35, 0.0  ;;  %v1443_v22 = vadd.f32 %v1442_v11, %v2937_v2 }
 0x1ef   :  { %v1429_v12 = vadd.f32 %v1427_v9, %v1426_v30  ;;  %v1452_v14 = vadd.f32 %v1451_v25, %v1450_v7 }
 0x1f0   :  { %v1389_v20 = vmax.f32 %v1383_v13, 0.0  ;;  %v1444_v27 = vrot.slane %v1443_v22, 2 }
 0x1f1   :  { %v1453_v23 = vrot.slane %v1452_v14, 4 }
 0x1f2   :  { %v1428_v48 = vadd.f32 %v1389_v20, %v1388_v19  ;;  %v1445_v29 = vadd.f32 %v1444_v27, %v1443_v22 }
 0x1f3   :  { %v1454_v26 = vadd.f32 %v1453_v23, %v1452_v14 }
 0x1f4   :  { %v1430_v42 = vadd.f32 %v1429_v12, %v1428_v48  ;;  %v1446_v33 = vrot.slane %v1445_v29, 1 }
 0x1f5   :  { %v1455_v28 = vrot.slane %v1454_v26, 2 }
 0x1f6   :  { %v1431_v49 = vrot.slane %v1430_v42, 4  ;;  %v1447_v34 = vadd.f32 %v1446_v33, %v1445_v29 }
 0x1f7   :  { %v1456_v51 = vadd.f32 %v1455_v28, %v1454_v26 }
 0x1f8   :  { %v1432_v54 = vadd.f32 %v1431_v49, %v1430_v42 }
 0x1f9   :  { %v1457_v6 = vrot.slane %v1456_v51, 1 }
 0x1fa   :  { %v1433_v18 = vrot.slane %v1432_v54, 2 }
 0x1fb   :  { %v1458_v50 = vadd.f32 %v1457_v6, %v1456_v51 }
 0x1fc   :  { %v1434_v59 = vadd.f32 %v1433_v18, %v1432_v54 }
 0x1fd   :  { %v1459_v2 = vmul.f32 0.5, %v1458_v50 }
 0x1fe   :  { %v1435_v53 = vrot.slane %v1434_v59, 1 }
 0x200   :  { %v1436_v17 = vadd.f32 %v1435_v53, %v1434_v59 }
 0x202   :  { %v1461_v24 = vsel %vm1460_vm12, %v1436_v17, %v1447_v34 }
 0x203   :  { %v1463_v16 = vsel %vm1462_vm13, %v1461_v24, %v1459_v2 }
 0x204   :  { %1464 = vst [vmem:[%s2991_s3] sm:$0x7] %v1463_v16 }

// kernel: _forward_impl.3
= control target key start
LH: loop header
LB: loop body
LE: loop exit
PB: predicated region body
PF: predicated region fallthrough
CT: control target
= control target key end

     0   :  { %s923_s12 = smov 0   ;;  %s1116_s0 = inlined_call_operand.vmem [shape: bf16[64,256], index: 0, kind: input, shape index: {}]   ;;  %s1117_s1 = inlined_call_operand.vmem [shape: bf16[64,256], index: 1, kind: input, shape index: {}]   ;;  %s1118_s2 = inlined_call_operand.vmem [shape: bf16[256,256], index: 2, kind: input, shape index: {}]   ;;  %s1119_s3 = inlined_call_operand.vmem [shape: f32[2,3,128], index: 3, kind: output, shape index: {}]  }
   0x1 LB: > { %s929_s13 = sadd.s32 4294967295, %s901_s12   ;;  %p751_p0 = scmp.ge.s32.totalorder %s901_s12, 1  ;;  %s901_s12 = sphi %s923_s12, %s13_s12  }
   0x2   : > { %p151_p1 = scmp.lt.s32.totalorder %s901_s12, 3 }
   0x4   : > { %p152_p2 = pnand %p751_p0, %p151_p1 }
   0x5   : > { %s752_s24 = sshll.u32 (!%p152_p2), %s929_s13, 2  ;;  %p195_p4 = scmp.lt.s32.totalorder (!%p152_p2), %s929_s13, 1 }
   0x6   : > { %155 = sbr.rel (%p152_p2) target bundleno = 332 (0x14c), region = 32  ;;  %p182_p3 = scmp.lt.s32.totalorder (!%p152_p2), %s752_s24, 7 }
   0xb   : > { %v811_v0 = vld [vmem:[%s1118_s2 + $0x74] ss:$8 sps:$4 sm:$0xff]   ;;  %v813_v1 = vld [vmem:[%s1118_s2 + $0x70] ss:$8 sps:$4 sm:$0xff]   ;;  %v814_v2 = vld [vmem:[%s1118_s2 + $0x64] ss:$8 sps:$4 sm:$0xff]  }
   0xc   : > { %415 = vmatprep.subr.bf16.mxu0 %v811_v0  ;;  %492 = vmatprep.subr.bf16.mxu1 %v811_v0  ;;  %v816_v3 = vld [vmem:[%s1118_s2 + $0x60] ss:$8 sps:$4 sm:$0xff]   ;;  %v817_v4 = vld [vmem:[%s1118_s2 + $0x54] ss:$8 sps:$4 sm:$0xff]   ;;  %v819_v5 = vld [vmem:[%s1118_s2 + $0x50] ss:$8 sps:$4 sm:$0xff]  }
   0xd   : > { %416 = vmatpush1.bf16.msra.mxu0 %v813_v1  ;;  %493 = vmatpush1.bf16.msra.mxu1 %v813_v1  ;;  %v820_v6 = vld [vmem:[%s1118_s2 + $0x44] ss:$8 sps:$4 sm:$0xff]   ;;  %v822_v7 = vld [vmem:[%s1118_s2 + $0x40] ss:$8 sps:$4 sm:$0xff]   ;;  %v823_v8 = vld [vmem:[%s1118_s2 + $0x34] ss:$8 sps:$4 sm:$0xff]  }
   0xe   : > { %417 = vmatprep.subr.bf16.mxu0 %v814_v2  ;;  %494 = vmatprep.subr.bf16.mxu1 %v814_v2  ;;  %s1121_s24 = smov (!%p182_p3, %s752_s24), 7  ;;  %v825_v9 = vld [vmem:[%s1118_s2 + $0x30] ss:$8 sps:$4 sm:$0xff]   ;;  %v826_v10 = vld [vmem:[%s1118_s2 + $0x24] ss:$8 sps:$4 sm:$0xff]   ;;  %s1123_s13 = smov (!%p195_p4, %s929_s13), 1 }
   0xf   : > { %s801_s10 = sshll.u32 %s1121_s24, 3  ;;  %v828_v11 = vld [vmem:[%s1118_s2 + $0x20] ss:$8 sps:$4 sm:$0xff]   ;;  %v829_v12 = vld [vmem:[%s1118_s2 + $0x14] ss:$8 sps:$4 sm:$0xff]   ;;  %vm677_vm8 = vcmask 1040384  }
  0x10   : > { %s973_s17 = scalar_lea.vmem %s1116_s0, %s801_s10  ;;  %s981_s22 = scalar_lea.vmem %s1117_s1, %s801_s10  ;;  %v831_v14 = vld [vmem:[%s1118_s2 + $0x10] ss:$8 sps:$4 sm:$0xff]   ;;  %v832_v16 = vld [vmem:[%s1118_s2 + $0x4] ss:$8 sps:$4 sm:$0xff]   ;;  %v834_v17 = vld [vmem:[%s1118_s2] ss:$8 sps:$4 sm:$0xff]  }
  0x11   : > { %418 = vmatpush1.bf16.msra.mxu0 %v816_v3  ;;  %495 = vmatpush1.bf16.msra.mxu1 %v816_v3  ;;  %v861_v13 = vld [vmem:[%s973_s17 + $0x4] ss:$8 sps:$4 sm:$0xff]   ;;  %v835_v18 = vld [vmem:[%s1118_s2 + $0xf4] ss:$8 sps:$4 sm:$0xff]   ;;  %v837_v19 = vld [vmem:[%s1118_s2 + $0xf0] ss:$8 sps:$4 sm:$0xff]  }
  0x12   : > { %419 = vmatprep.subr.bf16.mxu0 %v817_v4  ;;  %496 = vmatprep.subr.bf16.mxu1 %v817_v4  ;;  %v864_v15 = vld [vmem:[%s981_s22 + $0x4] ss:$8 sps:$4 sm:$0xff]   ;;  %v840_v21 = vld [vmem:[%s1118_s2 + $0xe0] ss:$8 sps:$4 sm:$0xff]   ;;  %v841_v22 = vld [vmem:[%s1118_s2 + $0xd4] ss:$8 sps:$4 sm:$0xff]  }
  0x13   : > { %447 = vmatprep.mubr.bf16.mxu0 %v861_v13  ;;  %524 = vmatprep.mubr.bf16.mxu1 %v864_v15  ;;  %v838_v20 = vld [vmem:[%s1118_s2 + $0xe4] ss:$8 sps:$4 sm:$0xff]   ;;  %v843_v23 = vld [vmem:[%s1118_s2 + $0xd0] ss:$8 sps:$4 sm:$0xff]   ;;  %v846_v25 = vld [vmem:[%s1118_s2 + $0xc0] ss:$8 sps:$4 sm:$0xff]  }
  0x14   : > { %v844_v24 = vld [vmem:[%s1118_s2 + $0xc4] ss:$8 sps:$4 sm:$0xff]   ;;  %v847_v26 = vld [vmem:[%s1118_s2 + $0xb4] ss:$8 sps:$4 sm:$0xff]   ;;  %v849_v27 = vld [vmem:[%s1118_s2 + $0xb0] ss:$8 sps:$4 sm:$0xff]  }
  0x15   : > { %420 = vmatpush1.bf16.msra.mxu0 %v819_v5  ;;  %497 = vmatpush1.bf16.msra.mxu1 %v819_v5  ;;  %v850_v28 = vld [vmem:[%s1118_s2 + $0xa4] ss:$8 sps:$4 sm:$0xff]   ;;  %v852_v29 = vld [vmem:[%s1118_s2 + $0xa0] ss:$8 sps:$4 sm:$0xff]   ;;  %v853_v30 = vld [vmem:[%s1118_s2 + $0x94] ss:$8 sps:$4 sm:$0xff]  }
  0x16   : > { %421 = vmatprep.subr.bf16.mxu0 %v820_v6  ;;  %498 = vmatprep.subr.bf16.mxu1 %v820_v6  ;;  %v855_v31 = vld [vmem:[%s1118_s2 + $0x90] ss:$8 sps:$4 sm:$0xff]   ;;  %v856_v32 = vld [vmem:[%s1118_s2 + $0x84] ss:$8 sps:$4 sm:$0xff]   ;;  %v858_v33 = vld [vmem:[%s1118_s2 + $0x80] ss:$8 sps:$4 sm:$0xff]  }
  0x17   : > { %v859_v34 = vld [vmem:[%s973_s17] ss:$8 sps:$4 sm:$0xff]   ;;  %v865_v36 = vld [vmem:[%s973_s17 + $0x14] ss:$8 sps:$4 sm:$0xff]   ;;  %v869_v38 = vld [vmem:[%s973_s17 + $0x10] ss:$8 sps:$4 sm:$0xff]  }
  0x18   : > { %v862_v35 = vld [vmem:[%s981_s22] ss:$8 sps:$4 sm:$0xff]   ;;  %v867_v37 = vld [vmem:[%s981_s22 + $0x14] ss:$8 sps:$4 sm:$0xff]   ;;  %v870_v39 = vld [vmem:[%s981_s22 + $0x10] ss:$8 sps:$4 sm:$0xff]  }
  0x19   : > { %422 = vmatpush1.bf16.msra.mxu0 %v822_v7  ;;  %499 = vmatpush1.bf16.msra.mxu1 %v822_v7  ;;  %s758_s17 = sshll.u32 %s1123_s13, 2  ;;  %vm679_vm9 = vcmask 1041408  }
  0x1a   : > { %423 = vmatprep.subr.bf16.mxu0 %v823_v8  ;;  %500 = vmatprep.subr.bf16.mxu1 %v823_v8  ;;  %s198_s14 = scalar_lea.vmem %s1119_s3, %s758_s17 }
  0x1d   : > { %424 = vmatpush1.bf16.msra.mxu0 %v825_v9  ;;  %501 = vmatpush1.bf16.msra.mxu1 %v825_v9 }
  0x1e   : > { %425 = vmatprep.subr.bf16.mxu0 %v826_v10  ;;  %502 = vmatprep.subr.bf16.mxu1 %v826_v10 }
  0x21   : > { %426 = vmatpush1.bf16.msra.mxu0 %v828_v11  ;;  %503 = vmatpush1.bf16.msra.mxu1 %v828_v11 }
  0x22   : > { %427 = vmatprep.subr.bf16.mxu0 %v829_v12  ;;  %504 = vmatprep.subr.bf16.mxu1 %v829_v12 }
  0x25   : > { %428 = vmatpush1.bf16.msra.mxu0 %v831_v14  ;;  %505 = vmatpush1.bf16.msra.mxu1 %v831_v14 }
  0x26   : > { %429 = vmatprep.subr.bf16.mxu0 %v832_v16  ;;  %506 = vmatprep.subr.bf16.mxu1 %v832_v16 }
  0x29   : > { %430 = vmatpush1.bf16.msra.mxu0 %v834_v17  ;;  %507 = vmatpush1.bf16.msra.mxu1 %v834_v17 }
  0x2a   : > { %431 = vmatprep.subr.bf16.mxu0 %v835_v18  ;;  %508 = vmatprep.subr.bf16.mxu1 %v835_v18 }
  0x2d   : > { %432 = vmatpush2.bf16.msra.mxu0 %v837_v19  ;;  %509 = vmatpush2.bf16.msra.mxu1 %v837_v19 }
  0x2e   : > { %433 = vmatprep.subr.bf16.mxu0 %v838_v20  ;;  %510 = vmatprep.subr.bf16.mxu1 %v838_v20 }
  0x31   : > { %434 = vmatpush2.bf16.msra.mxu0 %v840_v21  ;;  %511 = vmatpush2.bf16.msra.mxu1 %v840_v21 }
  0x32   : > { %435 = vmatprep.subr.bf16.mxu0 %v841_v22  ;;  %512 = vmatprep.subr.bf16.mxu1 %v841_v22 }
  0x35   : > { %436 = vmatpush2.bf16.msra.mxu0 %v843_v23  ;;  %513 = vmatpush2.bf16.msra.mxu1 %v843_v23 }
  0x36   : > { %437 = vmatprep.subr.bf16.mxu0 %v844_v24  ;;  %514 = vmatprep.subr.bf16.mxu1 %v844_v24 }
  0x39   : > { %438 = vmatpush2.bf16.msra.mxu0 %v846_v25  ;;  %515 = vmatpush2.bf16.msra.mxu1 %v846_v25 }
  0x3a   : > { %439 = vmatprep.subr.bf16.mxu0 %v847_v26  ;;  %516 = vmatprep.subr.bf16.mxu1 %v847_v26 }
  0x3d   : > { %440 = vmatpush2.bf16.msra.mxu0 %v849_v27  ;;  %517 = vmatpush2.bf16.msra.mxu1 %v849_v27 }
  0x3e   : > { %441 = vmatprep.subr.bf16.mxu0 %v850_v28  ;;  %518 = vmatprep.subr.bf16.mxu1 %v850_v28 }
  0x41   : > { %442 = vmatpush2.bf16.msra.mxu0 %v852_v29  ;;  %519 = vmatpush2.bf16.msra.mxu1 %v852_v29 }
  0x42   : > { %443 = vmatprep.subr.bf16.mxu0 %v853_v30  ;;  %520 = vmatprep.subr.bf16.mxu1 %v853_v30 }
  0x45   : > { %444 = vmatpush2.bf16.msra.mxu0 %v855_v31  ;;  %521 = vmatpush2.bf16.msra.mxu1 %v855_v31 }
  0x46   : > { %445 = vmatprep.subr.bf16.mxu0 %v856_v32  ;;  %522 = vmatprep.subr.bf16.mxu1 %v856_v32 }
  0x49   : > { %446 = vmatpush2.bf16.msra.mxu0 %v858_v33  ;;  %523 = vmatpush2.bf16.msra.mxu1 %v858_v33 }
  0x4c   : > { %448 = vmatmul.mubr.bf16.vlgmr.msra.gmra.mxu0 %v859_v34  ;;  %525 = vmatmul.mubr.bf16.vlgmr.msra.gmra.mxu1 %v862_v35 }
  0x4d   : > { %457 = vmatprep.mubr.bf16.mxu0 %v865_v36  ;;  %534 = vmatprep.mubr.bf16.mxu1 %v867_v37 }
  0x54   : > { %458 = vmatmul.mubr.bf16.gmra.mxu0 %v869_v38  ;;  %535 = vmatmul.mubr.bf16.gmra.mxu1 %v870_v39 }
 0x10c   : > { %v449_v40 = vpop.f32.mrf.mxu0  ;;  %v526_v41 = vpop.f32.mrf.mxu1 }
 0x10d   : > { %v545_v44 = vmul.f32 %v449_v40, %v449_v40  ;;  %v561_v45 = vmul.f32 %v526_v41, %v526_v41 }
 0x10e   : > { %v451_v42 = vpop.f32.mrf.mxu0  ;;  %v528_v43 = vpop.f32.mrf.mxu1 }
 0x10f   : > { %v549_v46 = vmul.f32 %v451_v42, %v451_v42  ;;  %v565_v47 = vmul.f32 %v528_v43, %v528_v43 }
 0x110   : > { %v453_v48 = vpop.f32.mrf.mxu0  ;;  %v530_v49 = vpop.f32.mrf.mxu1 }
 0x111   : > { %v553_v50 = vadd.f32 %v549_v46, %v545_v44  ;;  %v569_v51 = vadd.f32 %v565_v47, %v561_v45  ;;  %v546_v52 = vmul.f32 %v453_v48, %v453_v48  ;;  %v562_v59 = vmul.f32 %v530_v49, %v530_v49 }
 0x112   : > { %v455_v53 = vpop.f32.mrf.mxu0  ;;  %v532_v54 = vpop.f32.mrf.mxu1 }
 0x113   : > { %v1048_v55 = vmax.f32 %v553_v50, 1e-07  ;;  %v1050_v56 = vmax.f32 %v569_v51, 1e-07  ;;  %v550_v57 = vmul.f32 %v455_v53, %v455_v53  ;;  %v566_v58 = vmul.f32 %v532_v54, %v532_v54 }
 0x114   : > { %v459_v60 = vpop.f32.mrf.mxu0  ;;  %v536_v61 = vpop.f32.mrf.mxu1 }
 0x115   : > { %v1054_v62 = vmul.f32 %v1050_v56, %v1048_v55  ;;  %v554_v63 = vadd.f32 %v550_v57, %v546_v52  ;;  %871 = vlog2.f32 %v1048_v55  ;;  %v570_v0 = vadd.f32 %v566_v58, %v562_v59 }
 0x116   : > { %v461_v1 = vpop.f32.mrf.mxu0  ;;  %v538_v2 = vpop.f32.mrf.mxu1  ;;  %v547_v9 = vmul.f32 %v459_v60, %v459_v60  ;;  %v563_v10 = vmul.f32 %v536_v61, %v536_v61  ;;  %v577_v53 = vadd.f32 %v1050_v56, %v1048_v55 }
 0x117   : > { %873 = vrsqrt.f32 %v1054_v62  ;;  %v1058_v3 = vmax.f32 %v554_v63, 1e-07  ;;  %v1060_v4 = vmax.f32 %v570_v0, 1e-07  ;;  %v551_v5 = vmul.f32 %v461_v1, %v461_v1 }
 0x118   : > { %v567_v6 = vmul.f32 %v538_v2, %v538_v2  ;;  %v463_v7 = vpop.f32.mrf.mxu0  ;;  %v540_v8 = vpop.f32.mrf.mxu1  ;;  %875 = vlog2.f32 %v1050_v56  ;;  %vm587_vm0 = vcmp.eq.f32.partialorder %v1054_v62, inf  ;;  %vm589_vm1 = vcmp.eq.f32.partialorder %v1054_v62, 0.0 }
 0x119   : > { %877 = vlog2.f32 %v1058_v3  ;;  %v582_v11 = vmul.f32 %v1060_v4, %v1058_v3  ;;  %v548_v12 = vmul.f32 %v463_v7, %v463_v7  ;;  %v555_v15 = vadd.f32 %v551_v5, %v547_v9 }
 0x11a   : > { %v465_v13 = vpop.f32.mrf.mxu0  ;;  %v542_v14 = vpop.f32.mrf.mxu1  ;;  %879 = vlog2.f32 %v1060_v4  ;;  %v571_v16 = vadd.f32 %v567_v6, %v563_v10  ;;  %v564_v22 = vmul.f32 %v540_v8, %v540_v8  ;;  %v590_v41 = vand.u32 2147483648, %v1054_v62 }
 0x11b   : > { %v552_v17 = vmul.f32 %v465_v13, %v465_v13  ;;  %881 = vrsqrt.f32 %v582_v11  ;;  %v1067_v18 = vmax.f32 %v555_v15, 1e-07  ;;  %v568_v21 = vmul.f32 %v542_v14, %v542_v14 }
 0x11c   : > { %v1069_v19 = vmax.f32 %v571_v16, 1e-07  ;;  %vm594_vm2 = vcmp.eq.f32.partialorder %v582_v11, inf  ;;  %v597_v42 = vand.u32 2147483648, %v582_v11  ;;  %vm596_vm3 = vcmp.eq.f32.partialorder %v582_v11, 0.0 }
 0x11d   : > { %v556_v20 = vadd.f32 %v552_v17, %v548_v12  ;;  %883 = vlog2.f32 %v1067_v18  ;;  %v572_v25 = vadd.f32 %v568_v21, %v564_v22  ;;  %v658_v46 = vadd.f32 %v1060_v4, %v1050_v56 }
 0x11e   : > { %v583_v23 = vmul.f32 %v1069_v19, %v1067_v18  ;;  %885 = vlog2.f32 %v1069_v19  ;;  %v578_v54 = vadd.f32 %v1060_v4, %v1058_v3  ;;  %v579_v10 = vadd.f32 %v1069_v19, %v1067_v18 }
 0x11f   : > { %v1075_v24 = vmax.f32 %v556_v20, 1e-07  ;;  %v1078_v26 = vmax.f32 %v572_v25, 1e-07 }
 0x120   : > { %887 = vrsqrt.f32 %v583_v23  ;;  %vm601_vm4 = vcmp.eq.f32.partialorder %v583_v23, inf  ;;  %v604_v61 = vand.u32 2147483648, %v583_v23  ;;  %vm603_vm5 = vcmp.eq.f32.partialorder %v583_v23, 0.0 }
 0x121   : > { %889 = vlog2.f32 %v1075_v24  ;;  %v1082_v29 = vmul.f32 %v1078_v26, %v1075_v24  ;;  %v580_v18 = vadd.f32 %v1078_v26, %v1075_v24 }
 0x122   : > { %v872_v27 = vpop.eup %871  ;;  %891 = vlog2.f32 %v1078_v26 }
 0x123   : > { %893 = vrsqrt.f32 %v1082_v29  ;;  %v634_v36 = vmul.f32 0.6931472, %v872_v27  ;;  %vm608_vm6 = vcmp.eq.f32.partialorder %v1082_v29, inf  ;;  %vm610_vm7 = vcmp.eq.f32.partialorder %v1082_v29, 0.0 }
 0x124   : > { %v874_v28 = vpop.eup %873  ;;  %v611_v17 = vand.u32 2147483648, %v1082_v29 }
 0x125   : > { %v876_v30 = vpop.eup %875  ;;  %v586_v31 = vmul.f32 %v874_v28, %v1054_v62 }
 0x126   : > { %v878_v32 = vpop.eup %877  ;;  %v626_v37 = vmul.f32 0.6931472, %v876_v30 }
 0x127   : > { %v880_v33 = vpop.eup %879  ;;  %v636_v34 = vmul.f32 0.6931472, %v878_v32  ;;  %v588_v39 = vsel %vm587_vm0, %v1054_v62, %v586_v31  ;;  %v659_v62 = vadd.f32 %v658_v46, %v1069_v19 }
 0x128   : > { %v882_v35 = vpop.eup %881  ;;  %v628_v38 = vmul.f32 0.6931472, %v880_v33  ;;  %v591_v48 = vsel %vm589_vm1, %v590_v41, %v588_v39  ;;  %v641_v49 = vsub.f32 %v626_v37, %v634_v36 }
 0x129   : > { %v593_v40 = vmul.f32 %v882_v35, %v582_v11  ;;  %v613_v63 = vmul.f32 2.0, %v591_v48  ;;  %v660_v55 = vadd.f32 %v659_v62, %v1078_v26 }
 0x12a   : > { %v884_v43 = vpop.eup %883  ;;  %v642_v45 = vsub.f32 %v628_v38, %v636_v34  ;;  %v645_v6 = vand.u32 2147483647, %v641_v49 }
 0x12b   : > { %v595_v44 = vsel %vm594_vm2, %v582_v11, %v593_v40  ;;  %v886_v47 = vpop.eup %885  ;;  %v638_v51 = vmul.f32 0.6931472, %v884_v43  ;;  %v617_v12 = vsub.f32 %v577_v53, %v613_v63  ;;  %v661_v20 = vrot.slane %v660_v55, 4 }
 0x12c   : > { %v598_v50 = vsel %vm596_vm3, %v597_v42, %v595_v44  ;;  %v630_v58 = vmul.f32 0.6931472, %v886_v47  ;;  %v646_v0 = vand.u32 2147483647, %v642_v45 }
 0x12d   : > { %v888_v52 = vpop.eup %887  ;;  %v614_v57 = vmul.f32 2.0, %v598_v50  ;;  %v621_v27 = vmax.f32 %v617_v12, 0.0  ;;  %v662_v34 = vadd.f32 %v661_v20, %v660_v55 }
 0x12e   : > { %v890_v59 = vpop.eup %889  ;;  %v600_v60 = vmul.f32 %v888_v52, %v583_v23  ;;  %v643_v1 = vsub.f32 %v630_v58, %v638_v51  ;;  %v667_v13 = vadd.f32 %v646_v0, %v645_v6 }
 0x12f   : > { %v640_v2 = vmul.f32 0.6931472, %v890_v59  ;;  %v892_v5 = vpop.eup %891  ;;  %v618_v56 = vsub.f32 %v578_v54, %v614_v57 }
 0x130   : > { %v602_v7 = vsel %vm601_vm4, %v583_v23, %v600_v60  ;;  %v647_v4 = vand.u32 2147483647, %v643_v1  ;;  %v632_v8 = vmul.f32 0.6931472, %v892_v5  ;;  %v894_v9 = vpop.eup %893 }
 0x131   : > { %v605_v3 = vsel %vm603_vm5, %v604_v61, %v602_v7  ;;  %v607_v14 = vmul.f32 %v894_v9, %v1082_v29  ;;  %v622_v21 = vmax.f32 %v618_v56, 0.0 }
 0x132   : > { %v615_v11 = vmul.f32 2.0, %v605_v3  ;;  %v644_v15 = vsub.f32 %v632_v8, %v640_v2  ;;  %v668_v22 = vadd.f32 %v667_v13, %v647_v4 }
 0x133   : > { %v609_v23 = vsel %vm608_vm6, %v1082_v29, %v607_v14  ;;  %v649_v32 = vadd.f32 %v622_v21, %v621_v27  ;;  %v663_v29 = vrot.slane %v662_v34, 2 }
 0x134   : > { %v619_v16 = vsub.f32 %v579_v10, %v615_v11  ;;  %v648_v25 = vand.u32 2147483647, %v644_v15  ;;  %v612_v19 = vsel %vm610_vm7, %v611_v17, %v609_v23 }
 0x135   : > { %v616_v30 = vmul.f32 2.0, %v612_v19  ;;  %v664_v42 = vadd.f32 %v663_v29, %v662_v34 }
 0x136   : > { %v623_v28 = vmax.f32 %v619_v16, 0.0  ;;  %v669_v31 = vadd.f32 %v668_v22, %v648_v25 }
 0x137   : > { %v620_v33 = vsub.f32 %v580_v18, %v616_v30  ;;  %v665_v46 = vrot.slane %v664_v42, 1 }
 0x138   : > { %v670_v35 = vrot.slane %v669_v31, 4  ;;  %v650_v36 = vadd.f32 %v649_v32, %v623_v28 }
 0x139   : > { %v624_v37 = vmax.f32 %v620_v33, 0.0  ;;  %v666_v50 = vadd.f32 %v665_v46, %v664_v42 }
 0x13a   : > { %v671_v38 = vadd.f32 %v670_v35, %v669_v31 }
 0x13b   : > { %v651_v39 = vadd.f32 %v650_v36, %v624_v37 }
 0x13c   : > { %v672_v40 = vrot.slane %v671_v38, 2 }
 0x13d   : > { %v652_v41 = vrot.slane %v651_v39, 4 }
 0x13e   : > { %v673_v24 = vadd.f32 %v672_v40, %v671_v38 }
 0x13f   : > { %v653_v26 = vadd.f32 %v652_v41, %v651_v39 }
 0x140   : > { %v674_v43 = vrot.slane %v673_v24, 1 }
 0x141   : > { %v654_v44 = vrot.slane %v653_v26, 2 }
 0x142   : > { %v675_v47 = vadd.f32 %v674_v43, %v673_v24 }
 0x143   : > { %v655_v45 = vadd.f32 %v654_v44, %v653_v26 }
 0x144   : > { %v676_v51 = vmul.f32 0.5, %v675_v47 }
 0x145   : > { %v656_v48 = vrot.slane %v655_v45, 1 }
 0x147   : > { %v657_v49 = vadd.f32 %v656_v48, %v655_v45 }
 0x149   : > { %v678_v52 = vsel %vm677_vm8, %v657_v49, %v666_v50 }
 0x14a   : > { %v680_v53 = vsel %vm679_vm9, %v678_v52, %v676_v51 }
 0x14b   : > { %681 = vst [vmem:[%s198_s14] sm:$0x7] %v680_v53 }
 0x14c PF: > { %s13_s12 = sadd.s32 1, %s901_s12  }
 0x14d   : > { %p10_p5 = scmp.ge.s32.totalorder %s13_s12, 4  }
 0x14f   :  { %12 = sbr.rel (!%p10_p5) target bundleno = 1 (0x1), region = 65 }

// kernel: _forward_impl.5
= control target key start
LH: loop header
LB: loop body
LE: loop exit
PB: predicated region body
PF: predicated region fallthrough
CT: control target
= control target key end

     0   :  { %s752_s12 = smov 0   ;;  %s893_s0 = inlined_call_operand.vmem [shape: bf16[96,128], index: 0, kind: input, shape index: {}]   ;;  %s894_s1 = inlined_call_operand.vmem [shape: bf16[96,128], index: 1, kind: input, shape index: {}]   ;;  %s895_s2 = inlined_call_operand.vmem [shape: bf16[128,256], index: 2, kind: input, shape index: {}]   ;;  %s896_s3 = inlined_call_operand.vmem [shape: f32[3,3,128], index: 3, kind: output, shape index: {}]  }
   0x1 LB: > { %s758_s13 = sadd.s32 4294967295, %s729_s12   ;;  %p634_p0 = scmp.ge.s32.totalorder %s729_s12, 1  ;;  %s729_s12 = sphi %s752_s12, %s13_s12  }
   0x2   : > { %p149_p1 = scmp.lt.s32.totalorder %s729_s12, 4 }
   0x4   : > { %p150_p2 = pnand %p634_p0, %p149_p1 }
   0x5   : > { %s635_s16 = sshll.u32 (!%p150_p2), %s758_s13, 2  ;;  %p189_p4 = scmp.lt.s32.totalorder (!%p150_p2), %s758_s13, 2 }
   0x6   : > { %153 = sbr.rel (%p150_p2) target bundleno = 301 (0x12d), region = 32  ;;  %p178_p3 = scmp.lt.s32.totalorder (!%p150_p2), %s635_s16, 11 }
   0xb   : > { %v671_v0 = vld [vmem:[%s895_s2 + $0x74] ss:$8 sps:$4 sm:$0xff]   ;;  %v673_v1 = vld [vmem:[%s895_s2 + $0x70] ss:$8 sps:$4 sm:$0xff]   ;;  %v731_v2 = vmov 0   ;;  %s898_s16 = smov (!%p178_p3, %s635_s16), 11 }
   0xc   : > { %338 = vmatprep.mubr.bf16.mxu0 %v731_v2  ;;  %407 = vmatprep.mubr.bf16.mxu1 %v731_v2  ;;  %v674_v3 = vld [vmem:[%s895_s2 + $0x64] ss:$8 sps:$4 sm:$0xff]   ;;  %v676_v4 = vld [vmem:[%s895_s2 + $0x60] ss:$8 sps:$4 sm:$0xff]   ;;  %v677_v5 = vld [vmem:[%s895_s2 + $0x54] ss:$8 sps:$4 sm:$0xff]  }
   0xd   : > { %306 = vmatprep.subr.bf16.mxu0 %v671_v0  ;;  %375 = vmatprep.subr.bf16.mxu1 %v671_v0  ;;  %s636_s25 = sshll.u32 %s898_s16, 2  ;;  %v679_v6 = vld [vmem:[%s895_s2 + $0x50] ss:$8 sps:$4 sm:$0xff]   ;;  %v680_v7 = vld [vmem:[%s895_s2 + $0x44] ss:$8 sps:$4 sm:$0xff]   ;;  %s900_s13 = smov (!%p189_p4, %s758_s13), 2 }
   0xe   : > { %307 = vmatpush1.bf16.msra.mxu0 %v673_v1  ;;  %376 = vmatpush1.bf16.msra.mxu1 %v673_v1  ;;  %s787_s5 = scalar_lea.vmem %s893_s0, %s636_s25  ;;  %s792_s8 = scalar_lea.vmem %s894_s1, %s636_s25  ;;  %v682_v8 = vld [vmem:[%s895_s2 + $0x40] ss:$8 sps:$4 sm:$0xff]   ;;  %v683_v9 = vld [vmem:[%s895_s2 + $0x34] ss:$8 sps:$4 sm:$0xff]   ;;  %v685_v10 = vld [vmem:[%s895_s2 + $0x30] ss:$8 sps:$4 sm:$0xff]  }
   0xf   : > { %308 = vmatprep.subr.bf16.mxu0 %v674_v3  ;;  %377 = vmatprep.subr.bf16.mxu1 %v674_v3  ;;  %v686_v11 = vld [vmem:[%s895_s2 + $0x24] ss:$8 sps:$4 sm:$0xff]   ;;  %v688_v12 = vld [vmem:[%s895_s2 + $0x20] ss:$8 sps:$4 sm:$0xff]   ;;  %v689_v13 = vld [vmem:[%s895_s2 + $0x14] ss:$8 sps:$4 sm:$0xff]  }
  0x10   : > { %v691_v14 = vld [vmem:[%s895_s2 + $0x10] ss:$8 sps:$4 sm:$0xff]   ;;  %v692_v15 = vld [vmem:[%s895_s2 + $0x4] ss:$8 sps:$4 sm:$0xff]   ;;  %v694_v16 = vld [vmem:[%s895_s2] ss:$8 sps:$4 sm:$0xff]  }
  0x11   : > { %v695_v17 = vld [vmem:[%s787_s5] sm:$0xff]   ;;  %v697_v19 = vld [vmem:[%s787_s5 + $0x8] sm:$0xff]   ;;  %s639_s29 = sshll.u32 %s900_s13, 2  ;;  %vm560_vm8 = vcmask 1040384   ;;  %vm562_vm9 = vcmask 1041408  }
  0x12   : > { %309 = vmatpush1.bf16.msra.mxu0 %v676_v4  ;;  %378 = vmatpush1.bf16.msra.mxu1 %v676_v4  ;;  %v696_v18 = vld [vmem:[%s792_s8] sm:$0xff]   ;;  %v698_v20 = vld [vmem:[%s792_s8 + $0x8] sm:$0xff]   ;;  %s192_s5 = scalar_lea.vmem %s896_s3, %s639_s29 }
  0x13   : > { %310 = vmatprep.subr.bf16.mxu0 %v677_v5  ;;  %379 = vmatprep.subr.bf16.mxu1 %v677_v5 }
  0x16   : > { %311 = vmatpush1.bf16.msra.mxu0 %v679_v6  ;;  %380 = vmatpush1.bf16.msra.mxu1 %v679_v6 }
  0x17   : > { %312 = vmatprep.subr.bf16.mxu0 %v680_v7  ;;  %381 = vmatprep.subr.bf16.mxu1 %v680_v7 }
  0x1a   : > { %313 = vmatpush1.bf16.msra.mxu0 %v682_v8  ;;  %382 = vmatpush1.bf16.msra.mxu1 %v682_v8 }
  0x1b   : > { %314 = vmatprep.subr.bf16.mxu0 %v683_v9  ;;  %383 = vmatprep.subr.bf16.mxu1 %v683_v9 }
  0x1e   : > { %315 = vmatpush1.bf16.msra.mxu0 %v685_v10  ;;  %384 = vmatpush1.bf16.msra.mxu1 %v685_v10 }
  0x1f   : > { %316 = vmatprep.subr.bf16.mxu0 %v686_v11  ;;  %385 = vmatprep.subr.bf16.mxu1 %v686_v11 }
  0x22   : > { %317 = vmatpush1.bf16.msra.mxu0 %v688_v12  ;;  %386 = vmatpush1.bf16.msra.mxu1 %v688_v12 }
  0x23   : > { %318 = vmatprep.subr.bf16.mxu0 %v689_v13  ;;  %387 = vmatprep.subr.bf16.mxu1 %v689_v13 }
  0x26   : > { %319 = vmatpush1.bf16.msra.mxu0 %v691_v14  ;;  %388 = vmatpush1.bf16.msra.mxu1 %v691_v14 }
  0x27   : > { %320 = vmatprep.subr.bf16.mxu0 %v692_v15  ;;  %389 = vmatprep.subr.bf16.mxu1 %v692_v15 }
  0x2a   : > { %321 = vmatpush1.bf16.msra.mxu0 %v694_v16  ;;  %390 = vmatpush1.bf16.msra.mxu1 %v694_v16 }
  0x2d   : > { %339 = vmatmul.mubr.bf16.vlgmr.msra.gmra.mxu0 %v695_v17  ;;  %408 = vmatmul.mubr.bf16.vlgmr.msra.gmra.mxu1 %v696_v18 }
  0x2e   : > { %348 = vmatprep.mubr.bf16.mxu0 %v731_v2  ;;  %417 = vmatprep.mubr.bf16.mxu1 %v731_v2 }
  0x35   : > { %349 = vmatmul.mubr.bf16.gmra.mxu0 %v697_v19  ;;  %418 = vmatmul.mubr.bf16.gmra.mxu1 %v698_v20 }
  0xed   : > { %v340_v21 = vpop.f32.mrf.mxu0  ;;  %v409_v22 = vpop.f32.mrf.mxu1 }
  0xee   : > { %v428_v25 = vmul.f32 %v340_v21, %v340_v21  ;;  %v444_v26 = vmul.f32 %v409_v22, %v409_v22 }
  0xef   : > { %v342_v23 = vpop.f32.mrf.mxu0  ;;  %v411_v24 = vpop.f32.mrf.mxu1 }
  0xf0   : > { %v432_v27 = vmul.f32 %v342_v23, %v342_v23  ;;  %v448_v28 = vmul.f32 %v411_v24, %v411_v24 }
  0xf1   : > { %v344_v29 = vpop.f32.mrf.mxu0  ;;  %v413_v30 = vpop.f32.mrf.mxu1 }
  0xf2   : > { %v436_v31 = vadd.f32 %v432_v27, %v428_v25  ;;  %v452_v32 = vadd.f32 %v448_v28, %v444_v26  ;;  %v429_v33 = vmul.f32 %v344_v29, %v344_v29  ;;  %v445_v40 = vmul.f32 %v413_v30, %v413_v30 }
  0xf3   : > { %v346_v34 = vpop.f32.mrf.mxu0  ;;  %v415_v35 = vpop.f32.mrf.mxu1 }
  0xf4   : > { %v825_v36 = vmax.f32 %v436_v31, 1e-07  ;;  %v827_v37 = vmax.f32 %v452_v32, 1e-07  ;;  %v433_v38 = vmul.f32 %v346_v34, %v346_v34  ;;  %v449_v39 = vmul.f32 %v415_v35, %v415_v35 }
  0xf5   : > { %v350_v41 = vpop.f32.mrf.mxu0  ;;  %v419_v42 = vpop.f32.mrf.mxu1 }
  0xf6   : > { %v831_v43 = vmul.f32 %v827_v37, %v825_v36  ;;  %v437_v44 = vadd.f32 %v433_v38, %v429_v33  ;;  %699 = vlog2.f32 %v825_v36  ;;  %v453_v45 = vadd.f32 %v449_v39, %v445_v40 }
  0xf7   : > { %v352_v46 = vpop.f32.mrf.mxu0  ;;  %v421_v47 = vpop.f32.mrf.mxu1  ;;  %v430_v54 = vmul.f32 %v350_v41, %v350_v41  ;;  %v446_v55 = vmul.f32 %v419_v42, %v419_v42  ;;  %v460_v34 = vadd.f32 %v827_v37, %v825_v36 }
  0xf8   : > { %701 = vrsqrt.f32 %v831_v43  ;;  %v835_v48 = vmax.f32 %v437_v44, 1e-07  ;;  %v837_v49 = vmax.f32 %v453_v45, 1e-07  ;;  %v434_v50 = vmul.f32 %v352_v46, %v352_v46 }
  0xf9   : > { %v450_v51 = vmul.f32 %v421_v47, %v421_v47  ;;  %v354_v52 = vpop.f32.mrf.mxu0  ;;  %v423_v53 = vpop.f32.mrf.mxu1  ;;  %703 = vlog2.f32 %v827_v37  ;;  %vm470_vm0 = vcmp.eq.f32.partialorder %v831_v43, inf  ;;  %vm472_vm1 = vcmp.eq.f32.partialorder %v831_v43, 0.0 }
  0xfa   : > { %705 = vlog2.f32 %v835_v48  ;;  %v465_v56 = vmul.f32 %v837_v49, %v835_v48  ;;  %v431_v57 = vmul.f32 %v354_v52, %v354_v52  ;;  %v438_v60 = vadd.f32 %v434_v50, %v430_v54 }
  0xfb   : > { %v356_v58 = vpop.f32.mrf.mxu0  ;;  %v425_v59 = vpop.f32.mrf.mxu1  ;;  %707 = vlog2.f32 %v837_v49  ;;  %v454_v61 = vadd.f32 %v450_v51, %v446_v55  ;;  %v447_v3 = vmul.f32 %v423_v53, %v423_v53  ;;  %v473_v22 = vand.u32 2147483648, %v831_v43 }
  0xfc   : > { %v435_v62 = vmul.f32 %v356_v58, %v356_v58  ;;  %709 = vrsqrt.f32 %v465_v56  ;;  %v844_v63 = vmax.f32 %v438_v60, 1e-07  ;;  %v451_v2 = vmul.f32 %v425_v59, %v425_v59 }
  0xfd   : > { %v846_v0 = vmax.f32 %v454_v61, 1e-07  ;;  %vm477_vm2 = vcmp.eq.f32.partialorder %v465_v56, inf  ;;  %v480_v23 = vand.u32 2147483648, %v465_v56  ;;  %vm479_vm3 = vcmp.eq.f32.partialorder %v465_v56, 0.0 }
  0xfe   : > { %v439_v1 = vadd.f32 %v435_v62, %v431_v57  ;;  %711 = vlog2.f32 %v844_v63  ;;  %v455_v6 = vadd.f32 %v451_v2, %v447_v3  ;;  %v541_v27 = vadd.f32 %v837_v49, %v827_v37 }
  0xff   : > { %v466_v4 = vmul.f32 %v846_v0, %v844_v63  ;;  %713 = vlog2.f32 %v846_v0  ;;  %v461_v35 = vadd.f32 %v837_v49, %v835_v48  ;;  %v462_v55 = vadd.f32 %v846_v0, %v844_v63 }
 0x100   : > { %v852_v5 = vmax.f32 %v439_v1, 1e-07  ;;  %v855_v7 = vmax.f32 %v455_v6, 1e-07 }
 0x101   : > { %715 = vrsqrt.f32 %v466_v4  ;;  %vm484_vm4 = vcmp.eq.f32.partialorder %v466_v4, inf  ;;  %v487_v42 = vand.u32 2147483648, %v466_v4  ;;  %vm486_vm5 = vcmp.eq.f32.partialorder %v466_v4, 0.0 }
 0x102   : > { %717 = vlog2.f32 %v852_v5  ;;  %v859_v10 = vmul.f32 %v855_v7, %v852_v5  ;;  %v463_v63 = vadd.f32 %v855_v7, %v852_v5 }
 0x103   : > { %v700_v8 = vpop.eup %699  ;;  %719 = vlog2.f32 %v855_v7 }
 0x104   : > { %721 = vrsqrt.f32 %v859_v10  ;;  %v517_v17 = vmul.f32 0.6931472, %v700_v8  ;;  %vm491_vm6 = vcmp.eq.f32.partialorder %v859_v10, inf  ;;  %vm493_vm7 = vcmp.eq.f32.partialorder %v859_v10, 0.0 }
 0x105   : > { %v702_v9 = vpop.eup %701  ;;  %v494_v62 = vand.u32 2147483648, %v859_v10 }
 0x106   : > { %v704_v11 = vpop.eup %703  ;;  %v469_v12 = vmul.f32 %v702_v9, %v831_v43 }
 0x107   : > { %v706_v13 = vpop.eup %705  ;;  %v509_v18 = vmul.f32 0.6931472, %v704_v11 }
 0x108   : > { %v708_v14 = vpop.eup %707  ;;  %v519_v15 = vmul.f32 0.6931472, %v706_v13  ;;  %v471_v20 = vsel %vm470_vm0, %v831_v43, %v469_v12  ;;  %v542_v43 = vadd.f32 %v541_v27, %v846_v0 }
 0x109   : > { %v710_v16 = vpop.eup %709  ;;  %v511_v19 = vmul.f32 0.6931472, %v708_v14  ;;  %v474_v29 = vsel %vm472_vm1, %v473_v22, %v471_v20  ;;  %v524_v30 = vsub.f32 %v509_v18, %v517_v17 }
 0x10a   : > { %v476_v21 = vmul.f32 %v710_v16, %v465_v56  ;;  %v496_v44 = vmul.f32 2.0, %v474_v29  ;;  %v543_v36 = vadd.f32 %v542_v43, %v855_v7 }
 0x10b   : > { %v712_v24 = vpop.eup %711  ;;  %v525_v26 = vsub.f32 %v511_v19, %v519_v15  ;;  %v528_v51 = vand.u32 2147483647, %v524_v30 }
 0x10c   : > { %v478_v25 = vsel %vm477_vm2, %v465_v56, %v476_v21  ;;  %v714_v28 = vpop.eup %713  ;;  %v521_v32 = vmul.f32 0.6931472, %v712_v24  ;;  %v500_v57 = vsub.f32 %v460_v34, %v496_v44  ;;  %v544_v1 = vrot.slane %v543_v36, 4 }
 0x10d   : > { %v481_v31 = vsel %vm479_vm3, %v480_v23, %v478_v25  ;;  %v513_v39 = vmul.f32 0.6931472, %v714_v28  ;;  %v529_v45 = vand.u32 2147483647, %v525_v26 }
 0x10e   : > { %v716_v33 = vpop.eup %715  ;;  %v497_v38 = vmul.f32 2.0, %v481_v31  ;;  %v504_v8 = vmax.f32 %v500_v57, 0.0  ;;  %v545_v15 = vadd.f32 %v544_v1, %v543_v36 }
 0x10f   : > { %v718_v40 = vpop.eup %717  ;;  %v483_v41 = vmul.f32 %v716_v33, %v466_v4  ;;  %v526_v46 = vsub.f32 %v513_v39, %v521_v32  ;;  %v550_v58 = vadd.f32 %v529_v45, %v528_v51 }
 0x110   : > { %v523_v47 = vmul.f32 0.6931472, %v718_v40  ;;  %v720_v50 = vpop.eup %719  ;;  %v501_v37 = vsub.f32 %v461_v35, %v497_v38 }
 0x111   : > { %v485_v52 = vsel %vm484_vm4, %v466_v4, %v483_v41  ;;  %v530_v49 = vand.u32 2147483647, %v526_v46  ;;  %v515_v53 = vmul.f32 0.6931472, %v720_v50  ;;  %v722_v54 = vpop.eup %721 }
 0x112   : > { %v488_v48 = vsel %vm486_vm5, %v487_v42, %v485_v52  ;;  %v490_v59 = vmul.f32 %v722_v54, %v859_v10  ;;  %v505_v2 = vmax.f32 %v501_v37, 0.0 }
 0x113   : > { %v498_v56 = vmul.f32 2.0, %v488_v48  ;;  %v527_v60 = vsub.f32 %v515_v53, %v523_v47  ;;  %v551_v3 = vadd.f32 %v550_v58, %v530_v49 }
 0x114   : > { %v492_v4 = vsel %vm491_vm6, %v859_v10, %v490_v59  ;;  %v532_v13 = vadd.f32 %v505_v2, %v504_v8  ;;  %v546_v10 = vrot.slane %v545_v15, 2 }
 0x115   : > { %v502_v61 = vsub.f32 %v462_v55, %v498_v56  ;;  %v531_v6 = vand.u32 2147483647, %v527_v60  ;;  %v495_v0 = vsel %vm493_vm7, %v494_v62, %v492_v4 }
 0x116   : > { %v499_v11 = vmul.f32 2.0, %v495_v0  ;;  %v547_v23 = vadd.f32 %v546_v10, %v545_v15 }
 0x117   : > { %v506_v9 = vmax.f32 %v502_v61, 0.0  ;;  %v552_v12 = vadd.f32 %v551_v3, %v531_v6 }
 0x118   : > { %v503_v14 = vsub.f32 %v463_v63, %v499_v11  ;;  %v548_v27 = vrot.slane %v547_v23, 1 }
 0x119   : > { %v553_v16 = vrot.slane %v552_v12, 4  ;;  %v533_v17 = vadd.f32 %v532_v13, %v506_v9 }
 0x11a   : > { %v507_v18 = vmax.f32 %v503_v14, 0.0  ;;  %v549_v31 = vadd.f32 %v548_v27, %v547_v23 }
 0x11b   : > { %v554_v19 = vadd.f32 %v553_v16, %v552_v12 }
 0x11c   : > { %v534_v20 = vadd.f32 %v533_v17, %v507_v18 }
 0x11d   : > { %v555_v21 = vrot.slane %v554_v19, 2 }
 0x11e   : > { %v535_v22 = vrot.slane %v534_v20, 4 }
 0x11f   : > { %v556_v5 = vadd.f32 %v555_v21, %v554_v19 }
 0x120   : > { %v536_v7 = vadd.f32 %v535_v22, %v534_v20 }
 0x121   : > { %v557_v24 = vrot.slane %v556_v5, 1 }
 0x122   : > { %v537_v25 = vrot.slane %v536_v7, 2 }
 0x123   : > { %v558_v28 = vadd.f32 %v557_v24, %v556_v5 }
 0x124   : > { %v538_v26 = vadd.f32 %v537_v25, %v536_v7 }
 0x125   : > { %v559_v32 = vmul.f32 0.5, %v558_v28 }
 0x126   : > { %v539_v29 = vrot.slane %v538_v26, 1 }
 0x128   : > { %v540_v30 = vadd.f32 %v539_v29, %v538_v26 }
 0x12a   : > { %v561_v33 = vsel %vm560_vm8, %v540_v30, %v549_v31 }
 0x12b   : > { %v563_v34 = vsel %vm562_vm9, %v561_v33, %v559_v32 }
 0x12c   : > { %564 = vst [vmem:[%s192_s5] sm:$0x7] %v563_v34 }
 0x12d PF: > { %s13_s12 = sadd.s32 1, %s729_s12  }
 0x12e   : > { %p10_p5 = scmp.ge.s32.totalorder %s13_s12, 5  }
 0x130   :  { %12 = sbr.rel (!%p10_p5) target bundleno = 1 (0x1), region = 65 }

</bundles_post_ra>
